<compile_context>
chip_gen: v7x
topology: tpu7x:2x2x1
jax: 0.10.0
libtpu: 0.0.40
codegen_flags: <defaults>
</compile_context>

<pallas_src>
import jax
import jax.numpy as jnp
from jax import lax
from jax.experimental import pallas as pl
from jax.experimental.pallas import tpu as pltpu  # noqa: F401

# ---- problem sizes (small, consistent with the module) ----
B, T = 2, 8
LATENT = 32       # opt.latent_size
HIDDEN_G = 32     # opt.hidden_G
INPUT_SIZE = 4    # opt.input_size
COND_SIZE = 4     # opt.condition_size (unused in forward)
OUT_PAD = 128     # lane-dense padded width of the kernel output


def generator_kernel(noise_ref,                    # (B, T)          f32
                     wih1_ref, whh1_ref, b1_ref,   # (1,4L), (L,4L), (1,4L)
                     w2_ref, b2_ref,               # (L+H,4H), (1,4H)
                     wfc_ref, bfc_ref,             # (H,OUT_PAD), (1,OUT_PAD)
                     out_ref):                     # (T*B, OUT_PAD)
    Bn, Tn = noise_ref.shape
    L = whh1_ref.shape[0]
    H = w2_ref.shape[1] // 4

    # Hoist all weight loads out of the (unrolled) time loop.
    wih1 = wih1_ref[...]
    whh1 = whh1_ref[...]
    b1 = b1_ref[...]
    w2 = w2_ref[...]
    b2 = b2_ref[...]

    # Projector-LSTM input contribution for every timestep at once:
    #   pre1[b, t, :] = noise[b, t] * W_ih1 + (b_ih1 + b_hh1)
    nz = noise_ref[...]                                         # (B, T)
    pre1 = nz[:, :, None] * wih1[None, :, :] + b1[None, :, :]   # (B, T, 4L)

    def gates_ifog(gates, n):
        # gate order is (i, f, o, g): one sigmoid over a contiguous 3n slab.
        sig = jax.nn.sigmoid(gates[:, :3 * n])
        i = sig[:, 0:n]
        f = sig[:, n:2 * n]
        o = sig[:, 2 * n:3 * n]
        g = jnp.tanh(gates[:, 3 * n:4 * n])
        return i, f, o, g

    h1 = jnp.zeros((Bn, L), jnp.float32)
    c1 = jnp.zeros((Bn, L), jnp.float32)
    h2 = jnp.zeros((Bn, H), jnp.float32)
    c2 = jnp.zeros((Bn, H), jnp.float32)

    h2_steps = []
    # Fully unrolled: Tn is static and tiny, recurrent state stays in vregs.
    for t in range(Tn):
        # ----- projector LSTM (1 -> latent) -----
        g1 = pre1[:, t, :] + jnp.dot(h1, whh1, preferred_element_type=jnp.float32)
        i1, f1, o1, gg1 = gates_ifog(g1, L)
        c1 = f1 * c1 + i1 * gg1
        h1 = o1 * jnp.tanh(c1)

        # ----- netG.rnn LSTM (latent -> hidden_G), fused input+recurrent matmul -----
        hh = jnp.concatenate([h1, h2], axis=1)                  # (B, L+H)
        g2 = jnp.dot(hh, w2, preferred_element_type=jnp.float32) + b2
        i2, f2, o2, gg2 = gates_ifog(g2, H)
        c2 = f2 * c2 + i2 * gg2
        h2 = o2 * jnp.tanh(c2)
        h2_steps.append(h2)

    # ----- deferred fc epilogue: one MXU push + one lane-dense store -----
    h2_all = jnp.concatenate(h2_steps, axis=0)                  # (T*B, H), time-major
    y = (jnp.dot(h2_all, wfc_ref[...], preferred_element_type=jnp.float32)
         + bfc_ref[...])
    out_ref[...] = jnp.maximum(y, 0.0)


def _reorder_ifog(w, n):
    # PyTorch LSTM gate order (i, f, g, o) -> (i, f, o, g) along the first axis.
    return jnp.concatenate([w[0:n], w[n:2 * n], w[3 * n:4 * n], w[2 * n:3 * n]],
                           axis=0)


def generator_forward(noise, condition, params):
    # condition is unused in the PyTorch forward (netG.embedding is never applied).
    del condition
    (wih1, whh1, bih1, bhh1,
     wih2, whh2, bih2, bhh2,
     wfc, bfc) = params
    Bn, Tn, _ = noise.shape
    L = whh1.shape[1]
    H = whh2.shape[1]
    I = wfc.shape[0]
    f32 = jnp.float32

    # Gate-reordered weights (i, f, o, g) so the kernel applies one contiguous
    # sigmoid slab per cell; biases fused (b_ih + b_hh).
    wih1_r = _reorder_ifog(wih1.astype(f32), L)            # (4L, 1)
    whh1_r = _reorder_ifog(whh1.astype(f32), L)            # (4L, L)
    b1_r = _reorder_ifog((bih1 + bhh1).astype(f32), L)     # (4L,)
    wih2_r = _reorder_ifog(wih2.astype(f32), H)            # (4H, L)
    whh2_r = _reorder_ifog(whh2.astype(f32), H)            # (4H, H)
    b2_r = _reorder_ifog((bih2 + bhh2).astype(f32), H)     # (4H,)

    # Fused LSTM2 weight: [h1; h2_prev] @ [W_ih2^T; W_hh2^T] in one MXU push.
    w2_fused = jnp.concatenate([wih2_r.T, whh2_r.T], axis=0)    # (L+H, 4H)

    # Pad fc weights/bias to a lane-dense (128-wide) output; wrapper slices back.
    out_pad = max(OUT_PAD, I)
    wfc_p = jnp.zeros((H, out_pad), f32).at[:, :I].set(wfc.T.astype(f32))
    bfc_p = jnp.zeros((1, out_pad), f32).at[:, :I].set(bfc.astype(f32).reshape(1, I))

    out_flat = pl.pallas_call(
        generator_kernel,
        out_shape=jax.ShapeDtypeStruct((Tn * Bn, out_pad), jnp.float32),
    )(noise.reshape(Bn, Tn).astype(f32),        # batch-first, no wrapper transpose
      wih1_r.T, whh1_r.T, b1_r.reshape(1, 4 * L),
      w2_fused, b2_r.reshape(1, 4 * H),
      wfc_p, bfc_p)

    out = out_flat.reshape(Tn, Bn, out_pad)[..., :I]            # (T, B, I)
    return jnp.transpose(out, (1, 0, 2))                        # (B, T, I)


# ---------------- pure-JAX reference (PyTorch LSTM semantics) ----------------
def _lstm_ref(x, wih, whh, bih, bhh):
    Bn = x.shape[0]
    Hn = whh.shape[1]

    def step(carry, xt):
        h, c = carry
        gates = xt @ wih.T + h @ whh.T + bih + bhh
        i, f, g, o = jnp.split(gates, 4, axis=-1)
        i, f, o = jax.nn.sigmoid(i), jax.nn.sigmoid(f), jax.nn.sigmoid(o)
        g = jnp.tanh(g)
        c = f * c + i * g
        h = o * jnp.tanh(c)
        return (h, c), h

    h0 = jnp.zeros((Bn, Hn), jnp.float32)
    (_, _), hs = lax.scan(step, (h0, h0), jnp.transpose(x, (1, 0, 2)))
    return jnp.transpose(hs, (1, 0, 2))


def generator_ref(noise, condition, params):
    (wih1, whh1, bih1, bhh1,
     wih2, whh2, bih2, bhh2,
     wfc, bfc) = params
    x = _lstm_ref(noise.astype(jnp.float32), wih1, whh1, bih1, bhh1)
    out = _lstm_ref(x, wih2, whh2, bih2, bhh2)
    return jnp.maximum(out @ wfc.T + bfc, 0.0)


# ---------------------------- parameter init ---------------------------------
def init_params(key):
    ks = jax.random.split(key, 10)

    def u(k, shape, bound):
        return jax.random.uniform(k, shape, jnp.float32, -bound, bound)

    kL = 1.0 / jnp.sqrt(LATENT)
    kH = 1.0 / jnp.sqrt(HIDDEN_G)
    wih1 = u(ks[0], (4 * LATENT, 1), kL)
    whh1 = u(ks[1], (4 * LATENT, LATENT), kL)
    bih1 = u(ks[2], (4 * LATENT,), kL)
    bhh1 = u(ks[3], (4 * LATENT,), kL)
    wih2 = u(ks[4], (4 * HIDDEN_G, LATENT), kH)
    whh2 = u(ks[5], (4 * HIDDEN_G, HIDDEN_G), kH)
    bih2 = u(ks[6], (4 * HIDDEN_G,), kH)
    bhh2 = u(ks[7], (4 * HIDDEN_G,), kH)
    wfc = u(ks[8], (INPUT_SIZE, HIDDEN_G), kH)
    bfc = u(ks[9], (INPUT_SIZE,), kH)
    # TODO(synk): netG.embedding (Linear(condition_size, hidden_G)) exists in __init__
    # but is never used in forward, so it is intentionally not instantiated here.
    return (wih1, whh1, bih1, bhh1, wih2, whh2, bih2, bhh2, wfc, bfc)


if __name__ == "__main__":
    root = jax.random.PRNGKey(0)
    k_params, k_noise, k_cond = jax.random.split(root, 3)

    params = init_params(k_params)
    noise = jax.random.normal(k_noise, (B, T, 1), jnp.float32)
    condition = jax.random.normal(k_cond, (B, COND_SIZE), jnp.float32)

    out = generator_forward(noise, condition, params)
    out = jax.block_until_ready(out)

    ref = generator_ref(noise, condition, params)
    assert out.shape == (B, T, INPUT_SIZE), out.shape
    assert jnp.allclose(out, ref, atol=1e-5, rtol=1e-5), \
        f"max abs err {jnp.max(jnp.abs(out - ref))}"

    print("KERNEL_OK")
</pallas_src>

<mosaic_0001>
module attributes {stable_mosaic.version = 11 : i64} {
  func.func @generator_kernel(%arg0: memref<2x8xf32, #tpu.memory_space<vmem>>, %arg1: memref<1x128xf32, #tpu.memory_space<vmem>>, %arg2: memref<32x128xf32, #tpu.memory_space<vmem>>, %arg3: memref<1x128xf32, #tpu.memory_space<vmem>>, %arg4: memref<64x128xf32, #tpu.memory_space<vmem>>, %arg5: memref<1x128xf32, #tpu.memory_space<vmem>>, %arg6: memref<32x128xf32, #tpu.memory_space<vmem>>, %arg7: memref<1x128xf32, #tpu.memory_space<vmem>>, %arg8: memref<16x128xf32, #tpu.memory_space<vmem>>) attributes {dimension_semantics = [], scalar_prefetch = 0 : i64, scratch_operands = 0 : i64, tpu.core_type = #tpu.core_type<tc>} {
    %c0 = arith.constant 0 : index
    %c0_0 = arith.constant 0 : index
    %0 = vector.load %arg1[%c0, %c0_0] : memref<1x128xf32, #tpu.memory_space<vmem>>, vector<1x128xf32>
    %c0_1 = arith.constant 0 : index
    %c0_2 = arith.constant 0 : index
    %1 = vector.load %arg2[%c0_1, %c0_2] : memref<32x128xf32, #tpu.memory_space<vmem>>, vector<32x128xf32>
    %c0_3 = arith.constant 0 : index
    %c0_4 = arith.constant 0 : index
    %2 = vector.load %arg3[%c0_3, %c0_4] : memref<1x128xf32, #tpu.memory_space<vmem>>, vector<1x128xf32>
    %c0_5 = arith.constant 0 : index
    %c0_6 = arith.constant 0 : index
    %3 = vector.load %arg4[%c0_5, %c0_6] : memref<64x128xf32, #tpu.memory_space<vmem>>, vector<64x128xf32>
    %c0_7 = arith.constant 0 : index
    %c0_8 = arith.constant 0 : index
    %4 = vector.load %arg5[%c0_7, %c0_8] : memref<1x128xf32, #tpu.memory_space<vmem>>, vector<1x128xf32>
    %c0_9 = arith.constant 0 : index
    %c0_10 = arith.constant 0 : index
    %5 = vector.load %arg0[%c0_9, %c0_10] : memref<2x8xf32, #tpu.memory_space<vmem>>, vector<2x8xf32>
    %6 = vector.shape_cast %5 : vector<2x8xf32> to vector<2x8x1xf32>
    %7 = vector.shape_cast %0 : vector<1x128xf32> to vector<1x1x128xf32>
    %8 = vector.broadcast %6 : vector<2x8x1xf32> to vector<2x8x128xf32>
    %9 = vector.broadcast %7 : vector<1x1x128xf32> to vector<2x8x128xf32>
    %10 = arith.mulf %8, %9 : vector<2x8x128xf32>
    %11 = vector.shape_cast %2 : vector<1x128xf32> to vector<1x1x128xf32>
    %12 = vector.broadcast %11 : vector<1x1x128xf32> to vector<2x8x128xf32>
    %13 = arith.addf %10, %12 : vector<2x8x128xf32>
    %cst = arith.constant 0.000000e+00 : f32
    %14 = vector.broadcast %cst : f32 to vector<2x32xf32>
    %cst_11 = arith.constant 0.000000e+00 : f32
    %15 = vector.broadcast %cst_11 : f32 to vector<2x32xf32>
    %cst_12 = arith.constant 0.000000e+00 : f32
    %16 = vector.broadcast %cst_12 : f32 to vector<2x32xf32>
    %cst_13 = arith.constant 0.000000e+00 : f32
    %17 = vector.broadcast %cst_13 : f32 to vector<2x32xf32>
    %18 = vector.extract_strided_slice %13 {offsets = [0, 0, 0], sizes = [2, 1, 128], strides = [1, 1, 1]} : vector<2x8x128xf32> to vector<2x1x128xf32>
    %19 = vector.shape_cast %18 : vector<2x1x128xf32> to vector<2x128xf32>
    %cst_14 = arith.constant dense<0.000000e+00> : vector<2x128xf32>
    %20 = tpu.matmul %14, %1, %cst_14 {dimension_numbers = #tpu.dot_dimension_numbers<[1], [0], [0], [1], [0, 0, 1, 1], [], []>} : vector<2x32xf32>, vector<32x128xf32>, vector<2x128xf32> -> vector<2x128xf32>
    %21 = arith.addf %19, %20 : vector<2x128xf32>
    %22 = vector.extract_strided_slice %21 {offsets = [0, 0], sizes = [2, 96], strides = [1, 1]} : vector<2x128xf32> to vector<2x96xf32>
    %23 = arith.negf %22 : vector<2x96xf32>
    %24 = math.exp %23 : vector<2x96xf32>
    %cst_15 = arith.constant 1.000000e+00 : f32
    %25 = vector.broadcast %cst_15 : f32 to vector<2x96xf32>
    %26 = arith.addf %25, %24 : vector<2x96xf32>
    %27 = arith.divf %25, %26 : vector<2x96xf32>
    %28 = vector.extract_strided_slice %27 {offsets = [0, 0], sizes = [2, 32], strides = [1, 1]} : vector<2x96xf32> to vector<2x32xf32>
    %29 = vector.extract_strided_slice %27 {offsets = [0, 32], sizes = [2, 32], strides = [1, 1]} : vector<2x96xf32> to vector<2x32xf32>
    %30 = vector.extract_strided_slice %27 {offsets = [0, 64], sizes = [2, 32], strides = [1, 1]} : vector<2x96xf32> to vector<2x32xf32>
    %31 = vector.extract_strided_slice %21 {offsets = [0, 96], sizes = [2, 32], strides = [1, 1]} : vector<2x128xf32> to vector<2x32xf32>
    %32 = math.tanh %31 : vector<2x32xf32>
    %33 = arith.mulf %29, %15 : vector<2x32xf32>
    %34 = arith.mulf %28, %32 : vector<2x32xf32>
    %35 = arith.addf %33, %34 : vector<2x32xf32>
    %36 = math.tanh %35 : vector<2x32xf32>
    %37 = arith.mulf %30, %36 : vector<2x32xf32>
    %38 = tpu.concatenate %37, %16 in 1 : vector<2x32xf32>, vector<2x32xf32> -> vector<2x64xf32>
    %cst_16 = arith.constant dense<0.000000e+00> : vector<2x128xf32>
    %39 = tpu.matmul %38, %3, %cst_16 {dimension_numbers = #tpu.dot_dimension_numbers<[1], [0], [0], [1], [0, 0, 1, 1], [], []>} : vector<2x64xf32>, vector<64x128xf32>, vector<2x128xf32> -> vector<2x128xf32>
    %40 = vector.broadcast %4 : vector<1x128xf32> to vector<2x128xf32>
    %41 = arith.addf %39, %40 : vector<2x128xf32>
    %42 = vector.extract_strided_slice %41 {offsets = [0, 0], sizes = [2, 96], strides = [1, 1]} : vector<2x128xf32> to vector<2x96xf32>
    %43 = arith.negf %42 : vector<2x96xf32>
    %44 = math.exp %43 : vector<2x96xf32>
    %cst_17 = arith.constant 1.000000e+00 : f32
    %45 = vector.broadcast %cst_17 : f32 to vector<2x96xf32>
    %46 = arith.addf %45, %44 : vector<2x96xf32>
    %47 = arith.divf %45, %46 : vector<2x96xf32>
    %48 = vector.extract_strided_slice %47 {offsets = [0, 0], sizes = [2, 32], strides = [1, 1]} : vector<2x96xf32> to vector<2x32xf32>
    %49 = vector.extract_strided_slice %47 {offsets = [0, 32], sizes = [2, 32], strides = [1, 1]} : vector<2x96xf32> to vector<2x32xf32>
    %50 = vector.extract_strided_slice %47 {offsets = [0, 64], sizes = [2, 32], strides = [1, 1]} : vector<2x96xf32> to vector<2x32xf32>
    %51 = vector.extract_strided_slice %41 {offsets = [0, 96], sizes = [2, 32], strides = [1, 1]} : vector<2x128xf32> to vector<2x32xf32>
    %52 = math.tanh %51 : vector<2x32xf32>
    %53 = arith.mulf %49, %17 : vector<2x32xf32>
    %54 = arith.mulf %48, %52 : vector<2x32xf32>
    %55 = arith.addf %53, %54 : vector<2x32xf32>
    %56 = math.tanh %55 : vector<2x32xf32>
    %57 = arith.mulf %50, %56 : vector<2x32xf32>
    %58 = vector.extract_strided_slice %13 {offsets = [0, 1, 0], sizes = [2, 1, 128], strides = [1, 1, 1]} : vector<2x8x128xf32> to vector<2x1x128xf32>
    %59 = vector.shape_cast %58 : vector<2x1x128xf32> to vector<2x128xf32>
    %cst_18 = arith.constant dense<0.000000e+00> : vector<2x128xf32>
    %60 = tpu.matmul %37, %1, %cst_18 {dimension_numbers = #tpu.dot_dimension_numbers<[1], [0], [0], [1], [0, 0, 1, 1], [], []>} : vector<2x32xf32>, vector<32x128xf32>, vector<2x128xf32> -> vector<2x128xf32>
    %61 = arith.addf %59, %60 : vector<2x128xf32>
    %62 = vector.extract_strided_slice %61 {offsets = [0, 0], sizes = [2, 96], strides = [1, 1]} : vector<2x128xf32> to vector<2x96xf32>
    %63 = arith.negf %62 : vector<2x96xf32>
    %64 = math.exp %63 : vector<2x96xf32>
    %cst_19 = arith.constant 1.000000e+00 : f32
    %65 = vector.broadcast %cst_19 : f32 to vector<2x96xf32>
    %66 = arith.addf %65, %64 : vector<2x96xf32>
    %67 = arith.divf %65, %66 : vector<2x96xf32>
    %68 = vector.extract_strided_slice %67 {offsets = [0, 0], sizes = [2, 32], strides = [1, 1]} : vector<2x96xf32> to vector<2x32xf32>
    %69 = vector.extract_strided_slice %67 {offsets = [0, 32], sizes = [2, 32], strides = [1, 1]} : vector<2x96xf32> to vector<2x32xf32>
    %70 = vector.extract_strided_slice %67 {offsets = [0, 64], sizes = [2, 32], strides = [1, 1]} : vector<2x96xf32> to vector<2x32xf32>
    %71 = vector.extract_strided_slice %61 {offsets = [0, 96], sizes = [2, 32], strides = [1, 1]} : vector<2x128xf32> to vector<2x32xf32>
    %72 = math.tanh %71 : vector<2x32xf32>
    %73 = arith.mulf %69, %35 : vector<2x32xf32>
    %74 = arith.mulf %68, %72 : vector<2x32xf32>
    %75 = arith.addf %73, %74 : vector<2x32xf32>
    %76 = math.tanh %75 : vector<2x32xf32>
    %77 = arith.mulf %70, %76 : vector<2x32xf32>
    %78 = tpu.concatenate %77, %57 in 1 : vector<2x32xf32>, vector<2x32xf32> -> vector<2x64xf32>
    %cst_20 = arith.constant dense<0.000000e+00> : vector<2x128xf32>
    %79 = tpu.matmul %78, %3, %cst_20 {dimension_numbers = #tpu.dot_dimension_numbers<[1], [0], [0], [1], [0, 0, 1, 1], [], []>} : vector<2x64xf32>, vector<64x128xf32>, vector<2x128xf32> -> vector<2x128xf32>
    %80 = vector.broadcast %4 : vector<1x128xf32> to vector<2x128xf32>
    %81 = arith.addf %79, %80 : vector<2x128xf32>
    %82 = vector.extract_strided_slice %81 {offsets = [0, 0], sizes = [2, 96], strides = [1, 1]} : vector<2x128xf32> to vector<2x96xf32>
    %83 = arith.negf %82 : vector<2x96xf32>
    %84 = math.exp %83 : vector<2x96xf32>
    %cst_21 = arith.constant 1.000000e+00 : f32
    %85 = vector.broadcast %cst_21 : f32 to vector<2x96xf32>
    %86 = arith.addf %85, %84 : vector<2x96xf32>
    %87 = arith.divf %85, %86 : vector<2x96xf32>
    %88 = vector.extract_strided_slice %87 {offsets = [0, 0], sizes = [2, 32], strides = [1, 1]} : vector<2x96xf32> to vector<2x32xf32>
    %89 = vector.extract_strided_slice %87 {offsets = [0, 32], sizes = [2, 32], strides = [1, 1]} : vector<2x96xf32> to vector<2x32xf32>
    %90 = vector.extract_strided_slice %87 {offsets = [0, 64], sizes = [2, 32], strides = [1, 1]} : vector<2x96xf32> to vector<2x32xf32>
    %91 = vector.extract_strided_slice %81 {offsets = [0, 96], sizes = [2, 32], strides = [1, 1]} : vector<2x128xf32> to vector<2x32xf32>
    %92 = math.tanh %91 : vector<2x32xf32>
    %93 = arith.mulf %89, %55 : vector<2x32xf32>
    %94 = arith.mulf %88, %92 : vector<2x32xf32>
    %95 = arith.addf %93, %94 : vector<2x32xf32>
    %96 = math.tanh %95 : vector<2x32xf32>
    %97 = arith.mulf %90, %96 : vector<2x32xf32>
    %98 = vector.extract_strided_slice %13 {offsets = [0, 2, 0], sizes = [2, 1, 128], strides = [1, 1, 1]} : vector<2x8x128xf32> to vector<2x1x128xf32>
    %99 = vector.shape_cast %98 : vector<2x1x128xf32> to vector<2x128xf32>
    %cst_22 = arith.constant dense<0.000000e+00> : vector<2x128xf32>
    %100 = tpu.matmul %77, %1, %cst_22 {dimension_numbers = #tpu.dot_dimension_numbers<[1], [0], [0], [1], [0, 0, 1, 1], [], []>} : vector<2x32xf32>, vector<32x128xf32>, vector<2x128xf32> -> vector<2x128xf32>
    %101 = arith.addf %99, %100 : vector<2x128xf32>
    %102 = vector.extract_strided_slice %101 {offsets = [0, 0], sizes = [2, 96], strides = [1, 1]} : vector<2x128xf32> to vector<2x96xf32>
    %103 = arith.negf %102 : vector<2x96xf32>
    %104 = math.exp %103 : vector<2x96xf32>
    %cst_23 = arith.constant 1.000000e+00 : f32
    %105 = vector.broadcast %cst_23 : f32 to vector<2x96xf32>
    %106 = arith.addf %105, %104 : vector<2x96xf32>
    %107 = arith.divf %105, %106 : vector<2x96xf32>
    %108 = vector.extract_strided_slice %107 {offsets = [0, 0], sizes = [2, 32], strides = [1, 1]} : vector<2x96xf32> to vector<2x32xf32>
    %109 = vector.extract_strided_slice %107 {offsets = [0, 32], sizes = [2, 32], strides = [1, 1]} : vector<2x96xf32> to vector<2x32xf32>
    %110 = vector.extract_strided_slice %107 {offsets = [0, 64], sizes = [2, 32], strides = [1, 1]} : vector<2x96xf32> to vector<2x32xf32>
    %111 = vector.extract_strided_slice %101 {offsets = [0, 96], sizes = [2, 32], strides = [1, 1]} : vector<2x128xf32> to vector<2x32xf32>
    %112 = math.tanh %111 : vector<2x32xf32>
    %113 = arith.mulf %109, %75 : vector<2x32xf32>
    %114 = arith.mulf %108, %112 : vector<2x32xf32>
    %115 = arith.addf %113, %114 : vector<2x32xf32>
    %116 = math.tanh %115 : vector<2x32xf32>
    %117 = arith.mulf %110, %116 : vector<2x32xf32>
    %118 = tpu.concatenate %117, %97 in 1 : vector<2x32xf32>, vector<2x32xf32> -> vector<2x64xf32>
    %cst_24 = arith.constant dense<0.000000e+00> : vector<2x128xf32>
    %119 = tpu.matmul %118, %3, %cst_24 {dimension_numbers = #tpu.dot_dimension_numbers<[1], [0], [0], [1], [0, 0, 1, 1], [], []>} : vector<2x64xf32>, vector<64x128xf32>, vector<2x128xf32> -> vector<2x128xf32>
    %120 = vector.broadcast %4 : vector<1x128xf32> to vector<2x128xf32>
    %121 = arith.addf %119, %120 : vector<2x128xf32>
    %122 = vector.extract_strided_slice %121 {offsets = [0, 0], sizes = [2, 96], strides = [1, 1]} : vector<2x128xf32> to vector<2x96xf32>
    %123 = arith.negf %122 : vector<2x96xf32>
    %124 = math.exp %123 : vector<2x96xf32>
    %cst_25 = arith.constant 1.000000e+00 : f32
    %125 = vector.broadcast %cst_25 : f32 to vector<2x96xf32>
    %126 = arith.addf %125, %124 : vector<2x96xf32>
    %127 = arith.divf %125, %126 : vector<2x96xf32>
    %128 = vector.extract_strided_slice %127 {offsets = [0, 0], sizes = [2, 32], strides = [1, 1]} : vector<2x96xf32> to vector<2x32xf32>
    %129 = vector.extract_strided_slice %127 {offsets = [0, 32], sizes = [2, 32], strides = [1, 1]} : vector<2x96xf32> to vector<2x32xf32>
    %130 = vector.extract_strided_slice %127 {offsets = [0, 64], sizes = [2, 32], strides = [1, 1]} : vector<2x96xf32> to vector<2x32xf32>
    %131 = vector.extract_strided_slice %121 {offsets = [0, 96], sizes = [2, 32], strides = [1, 1]} : vector<2x128xf32> to vector<2x32xf32>
    %132 = math.tanh %131 : vector<2x32xf32>
    %133 = arith.mulf %129, %95 : vector<2x32xf32>
    %134 = arith.mulf %128, %132 : vector<2x32xf32>
    %135 = arith.addf %133, %134 : vector<2x32xf32>
    %136 = math.tanh %135 : vector<2x32xf32>
    %137 = arith.mulf %130, %136 : vector<2x32xf32>
    %138 = vector.extract_strided_slice %13 {offsets = [0, 3, 0], sizes = [2, 1, 128], strides = [1, 1, 1]} : vector<2x8x128xf32> to vector<2x1x128xf32>
    %139 = vector.shape_cast %138 : vector<2x1x128xf32> to vector<2x128xf32>
    %cst_26 = arith.constant dense<0.000000e+00> : vector<2x128xf32>
    %140 = tpu.matmul %117, %1, %cst_26 {dimension_numbers = #tpu.dot_dimension_numbers<[1], [0], [0], [1], [0, 0, 1, 1], [], []>} : vector<2x32xf32>, vector<32x128xf32>, vector<2x128xf32> -> vector<2x128xf32>
    %141 = arith.addf %139, %140 : vector<2x128xf32>
    %142 = vector.extract_strided_slice %141 {offsets = [0, 0], sizes = [2, 96], strides = [1, 1]} : vector<2x128xf32> to vector<2x96xf32>
    %143 = arith.negf %142 : vector<2x96xf32>
    %144 = math.exp %143 : vector<2x96xf32>
    %cst_27 = arith.constant 1.000000e+00 : f32
    %145 = vector.broadcast %cst_27 : f32 to vector<2x96xf32>
    %146 = arith.addf %145, %144 : vector<2x96xf32>
    %147 = arith.divf %145, %146 : vector<2x96xf32>
    %148 = vector.extract_strided_slice %147 {offsets = [0, 0], sizes = [2, 32], strides = [1, 1]} : vector<2x96xf32> to vector<2x32xf32>
    %149 = vector.extract_strided_slice %147 {offsets = [0, 32], sizes = [2, 32], strides = [1, 1]} : vector<2x96xf32> to vector<2x32xf32>
    %150 = vector.extract_strided_slice %147 {offsets = [0, 64], sizes = [2, 32], strides = [1, 1]} : vector<2x96xf32> to vector<2x32xf32>
    %151 = vector.extract_strided_slice %141 {offsets = [0, 96], sizes = [2, 32], strides = [1, 1]} : vector<2x128xf32> to vector<2x32xf32>
    %152 = math.tanh %151 : vector<2x32xf32>
    %153 = arith.mulf %149, %115 : vector<2x32xf32>
    %154 = arith.mulf %148, %152 : vector<2x32xf32>
    %155 = arith.addf %153, %154 : vector<2x32xf32>
    %156 = math.tanh %155 : vector<2x32xf32>
    %157 = arith.mulf %150, %156 : vector<2x32xf32>
    %158 = tpu.concatenate %157, %137 in 1 : vector<2x32xf32>, vector<2x32xf32> -> vector<2x64xf32>
    %cst_28 = arith.constant dense<0.000000e+00> : vector<2x128xf32>
    %159 = tpu.matmul %158, %3, %cst_28 {dimension_numbers = #tpu.dot_dimension_numbers<[1], [0], [0], [1], [0, 0, 1, 1], [], []>} : vector<2x64xf32>, vector<64x128xf32>, vector<2x128xf32> -> vector<2x128xf32>
    %160 = vector.broadcast %4 : vector<1x128xf32> to vector<2x128xf32>
    %161 = arith.addf %159, %160 : vector<2x128xf32>
    %162 = vector.extract_strided_slice %161 {offsets = [0, 0], sizes = [2, 96], strides = [1, 1]} : vector<2x128xf32> to vector<2x96xf32>
    %163 = arith.negf %162 : vector<2x96xf32>
    %164 = math.exp %163 : vector<2x96xf32>
    %cst_29 = arith.constant 1.000000e+00 : f32
    %165 = vector.broadcast %cst_29 : f32 to vector<2x96xf32>
    %166 = arith.addf %165, %164 : vector<2x96xf32>
    %167 = arith.divf %165, %166 : vector<2x96xf32>
    %168 = vector.extract_strided_slice %167 {offsets = [0, 0], sizes = [2, 32], strides = [1, 1]} : vector<2x96xf32> to vector<2x32xf32>
    %169 = vector.extract_strided_slice %167 {offsets = [0, 32], sizes = [2, 32], strides = [1, 1]} : vector<2x96xf32> to vector<2x32xf32>
    %170 = vector.extract_strided_slice %167 {offsets = [0, 64], sizes = [2, 32], strides = [1, 1]} : vector<2x96xf32> to vector<2x32xf32>
    %171 = vector.extract_strided_slice %161 {offsets = [0, 96], sizes = [2, 32], strides = [1, 1]} : vector<2x128xf32> to vector<2x32xf32>
    %172 = math.tanh %171 : vector<2x32xf32>
    %173 = arith.mulf %169, %135 : vector<2x32xf32>
    %174 = arith.mulf %168, %172 : vector<2x32xf32>
    %175 = arith.addf %173, %174 : vector<2x32xf32>
    %176 = math.tanh %175 : vector<2x32xf32>
    %177 = arith.mulf %170, %176 : vector<2x32xf32>
    %178 = vector.extract_strided_slice %13 {offsets = [0, 4, 0], sizes = [2, 1, 128], strides = [1, 1, 1]} : vector<2x8x128xf32> to vector<2x1x128xf32>
    %179 = vector.shape_cast %178 : vector<2x1x128xf32> to vector<2x128xf32>
    %cst_30 = arith.constant dense<0.000000e+00> : vector<2x128xf32>
    %180 = tpu.matmul %157, %1, %cst_30 {dimension_numbers = #tpu.dot_dimension_numbers<[1], [0], [0], [1], [0, 0, 1, 1], [], []>} : vector<2x32xf32>, vector<32x128xf32>, vector<2x128xf32> -> vector<2x128xf32>
    %181 = arith.addf %179, %180 : vector<2x128xf32>
    %182 = vector.extract_strided_slice %181 {offsets = [0, 0], sizes = [2, 96], strides = [1, 1]} : vector<2x128xf32> to vector<2x96xf32>
    %183 = arith.negf %182 : vector<2x96xf32>
    %184 = math.exp %183 : vector<2x96xf32>
    %cst_31 = arith.constant 1.000000e+00 : f32
    %185 = vector.broadcast %cst_31 : f32 to vector<2x96xf32>
    %186 = arith.addf %185, %184 : vector<2x96xf32>
    %187 = arith.divf %185, %186 : vector<2x96xf32>
    %188 = vector.extract_strided_slice %187 {offsets = [0, 0], sizes = [2, 32], strides = [1, 1]} : vector<2x96xf32> to vector<2x32xf32>
    %189 = vector.extract_strided_slice %187 {offsets = [0, 32], sizes = [2, 32], strides = [1, 1]} : vector<2x96xf32> to vector<2x32xf32>
    %190 = vector.extract_strided_slice %187 {offsets = [0, 64], sizes = [2, 32], strides = [1, 1]} : vector<2x96xf32> to vector<2x32xf32>
    %191 = vector.extract_strided_slice %181 {offsets = [0, 96], sizes = [2, 32], strides = [1, 1]} : vector<2x128xf32> to vector<2x32xf32>
    %192 = math.tanh %191 : vector<2x32xf32>
    %193 = arith.mulf %189, %155 : vector<2x32xf32>
    %194 = arith.mulf %188, %192 : vector<2x32xf32>
    %195 = arith.addf %193, %194 : vector<2x32xf32>
    %196 = math.tanh %195 : vector<2x32xf32>
    %197 = arith.mulf %190, %196 : vector<2x32xf32>
    %198 = tpu.concatenate %197, %177 in 1 : vector<2x32xf32>, vector<2x32xf32> -> vector<2x64xf32>
    %cst_32 = arith.constant dense<0.000000e+00> : vector<2x128xf32>
    %199 = tpu.matmul %198, %3, %cst_32 {dimension_numbers = #tpu.dot_dimension_numbers<[1], [0], [0], [1], [0, 0, 1, 1], [], []>} : vector<2x64xf32>, vector<64x128xf32>, vector<2x128xf32> -> vector<2x128xf32>
    %200 = vector.broadcast %4 : vector<1x128xf32> to vector<2x128xf32>
    %201 = arith.addf %199, %200 : vector<2x128xf32>
    %202 = vector.extract_strided_slice %201 {offsets = [0, 0], sizes = [2, 96], strides = [1, 1]} : vector<2x128xf32> to vector<2x96xf32>
    %203 = arith.negf %202 : vector<2x96xf32>
    %204 = math.exp %203 : vector<2x96xf32>
    %cst_33 = arith.constant 1.000000e+00 : f32
    %205 = vector.broadcast %cst_33 : f32 to vector<2x96xf32>
    %206 = arith.addf %205, %204 : vector<2x96xf32>
    %207 = arith.divf %205, %206 : vector<2x96xf32>
    %208 = vector.extract_strided_slice %207 {offsets = [0, 0], sizes = [2, 32], strides = [1, 1]} : vector<2x96xf32> to vector<2x32xf32>
    %209 = vector.extract_strided_slice %207 {offsets = [0, 32], sizes = [2, 32], strides = [1, 1]} : vector<2x96xf32> to vector<2x32xf32>
    %210 = vector.extract_strided_slice %207 {offsets = [0, 64], sizes = [2, 32], strides = [1, 1]} : vector<2x96xf32> to vector<2x32xf32>
    %211 = vector.extract_strided_slice %201 {offsets = [0, 96], sizes = [2, 32], strides = [1, 1]} : vector<2x128xf32> to vector<2x32xf32>
    %212 = math.tanh %211 : vector<2x32xf32>
    %213 = arith.mulf %209, %175 : vector<2x32xf32>
    %214 = arith.mulf %208, %212 : vector<2x32xf32>
    %215 = arith.addf %213, %214 : vector<2x32xf32>
    %216 = math.tanh %215 : vector<2x32xf32>
    %217 = arith.mulf %210, %216 : vector<2x32xf32>
    %218 = vector.extract_strided_slice %13 {offsets = [0, 5, 0], sizes = [2, 1, 128], strides = [1, 1, 1]} : vector<2x8x128xf32> to vector<2x1x128xf32>
    %219 = vector.shape_cast %218 : vector<2x1x128xf32> to vector<2x128xf32>
    %cst_34 = arith.constant dense<0.000000e+00> : vector<2x128xf32>
    %220 = tpu.matmul %197, %1, %cst_34 {dimension_numbers = #tpu.dot_dimension_numbers<[1], [0], [0], [1], [0, 0, 1, 1], [], []>} : vector<2x32xf32>, vector<32x128xf32>, vector<2x128xf32> -> vector<2x128xf32>
    %221 = arith.addf %219, %220 : vector<2x128xf32>
    %222 = vector.extract_strided_slice %221 {offsets = [0, 0], sizes = [2, 96], strides = [1, 1]} : vector<2x128xf32> to vector<2x96xf32>
    %223 = arith.negf %222 : vector<2x96xf32>
    %224 = math.exp %223 : vector<2x96xf32>
    %cst_35 = arith.constant 1.000000e+00 : f32
    %225 = vector.broadcast %cst_35 : f32 to vector<2x96xf32>
    %226 = arith.addf %225, %224 : vector<2x96xf32>
    %227 = arith.divf %225, %226 : vector<2x96xf32>
    %228 = vector.extract_strided_slice %227 {offsets = [0, 0], sizes = [2, 32], strides = [1, 1]} : vector<2x96xf32> to vector<2x32xf32>
    %229 = vector.extract_strided_slice %227 {offsets = [0, 32], sizes = [2, 32], strides = [1, 1]} : vector<2x96xf32> to vector<2x32xf32>
    %230 = vector.extract_strided_slice %227 {offsets = [0, 64], sizes = [2, 32], strides = [1, 1]} : vector<2x96xf32> to vector<2x32xf32>
    %231 = vector.extract_strided_slice %221 {offsets = [0, 96], sizes = [2, 32], strides = [1, 1]} : vector<2x128xf32> to vector<2x32xf32>
    %232 = math.tanh %231 : vector<2x32xf32>
    %233 = arith.mulf %229, %195 : vector<2x32xf32>
    %234 = arith.mulf %228, %232 : vector<2x32xf32>
    %235 = arith.addf %233, %234 : vector<2x32xf32>
    %236 = math.tanh %235 : vector<2x32xf32>
    %237 = arith.mulf %230, %236 : vector<2x32xf32>
    %238 = tpu.concatenate %237, %217 in 1 : vector<2x32xf32>, vector<2x32xf32> -> vector<2x64xf32>
    %cst_36 = arith.constant dense<0.000000e+00> : vector<2x128xf32>
    %239 = tpu.matmul %238, %3, %cst_36 {dimension_numbers = #tpu.dot_dimension_numbers<[1], [0], [0], [1], [0, 0, 1, 1], [], []>} : vector<2x64xf32>, vector<64x128xf32>, vector<2x128xf32> -> vector<2x128xf32>
    %240 = vector.broadcast %4 : vector<1x128xf32> to vector<2x128xf32>
    %241 = arith.addf %239, %240 : vector<2x128xf32>
    %242 = vector.extract_strided_slice %241 {offsets = [0, 0], sizes = [2, 96], strides = [1, 1]} : vector<2x128xf32> to vector<2x96xf32>
    %243 = arith.negf %242 : vector<2x96xf32>
    %244 = math.exp %243 : vector<2x96xf32>
    %cst_37 = arith.constant 1.000000e+00 : f32
    %245 = vector.broadcast %cst_37 : f32 to vector<2x96xf32>
    %246 = arith.addf %245, %244 : vector<2x96xf32>
    %247 = arith.divf %245, %246 : vector<2x96xf32>
    %248 = vector.extract_strided_slice %247 {offsets = [0, 0], sizes = [2, 32], strides = [1, 1]} : vector<2x96xf32> to vector<2x32xf32>
    %249 = vector.extract_strided_slice %247 {offsets = [0, 32], sizes = [2, 32], strides = [1, 1]} : vector<2x96xf32> to vector<2x32xf32>
    %250 = vector.extract_strided_slice %247 {offsets = [0, 64], sizes = [2, 32], strides = [1, 1]} : vector<2x96xf32> to vector<2x32xf32>
    %251 = vector.extract_strided_slice %241 {offsets = [0, 96], sizes = [2, 32], strides = [1, 1]} : vector<2x128xf32> to vector<2x32xf32>
    %252 = math.tanh %251 : vector<2x32xf32>
    %253 = arith.mulf %249, %215 : vector<2x32xf32>
    %254 = arith.mulf %248, %252 : vector<2x32xf32>
    %255 = arith.addf %253, %254 : vector<2x32xf32>
    %256 = math.tanh %255 : vector<2x32xf32>
    %257 = arith.mulf %250, %256 : vector<2x32xf32>
    %258 = vector.extract_strided_slice %13 {offsets = [0, 6, 0], sizes = [2, 1, 128], strides = [1, 1, 1]} : vector<2x8x128xf32> to vector<2x1x128xf32>
    %259 = vector.shape_cast %258 : vector<2x1x128xf32> to vector<2x128xf32>
    %cst_38 = arith.constant dense<0.000000e+00> : vector<2x128xf32>
    %260 = tpu.matmul %237, %1, %cst_38 {dimension_numbers = #tpu.dot_dimension_numbers<[1], [0], [0], [1], [0, 0, 1, 1], [], []>} : vector<2x32xf32>, vector<32x128xf32>, vector<2x128xf32> -> vector<2x128xf32>
    %261 = arith.addf %259, %260 : vector<2x128xf32>
    %262 = vector.extract_strided_slice %261 {offsets = [0, 0], sizes = [2, 96], strides = [1, 1]} : vector<2x128xf32> to vector<2x96xf32>
    %263 = arith.negf %262 : vector<2x96xf32>
    %264 = math.exp %263 : vector<2x96xf32>
    %cst_39 = arith.constant 1.000000e+00 : f32
    %265 = vector.broadcast %cst_39 : f32 to vector<2x96xf32>
    %266 = arith.addf %265, %264 : vector<2x96xf32>
    %267 = arith.divf %265, %266 : vector<2x96xf32>
    %268 = vector.extract_strided_slice %267 {offsets = [0, 0], sizes = [2, 32], strides = [1, 1]} : vector<2x96xf32> to vector<2x32xf32>
    %269 = vector.extract_strided_slice %267 {offsets = [0, 32], sizes = [2, 32], strides = [1, 1]} : vector<2x96xf32> to vector<2x32xf32>
    %270 = vector.extract_strided_slice %267 {offsets = [0, 64], sizes = [2, 32], strides = [1, 1]} : vector<2x96xf32> to vector<2x32xf32>
    %271 = vector.extract_strided_slice %261 {offsets = [0, 96], sizes = [2, 32], strides = [1, 1]} : vector<2x128xf32> to vector<2x32xf32>
    %272 = math.tanh %271 : vector<2x32xf32>
    %273 = arith.mulf %269, %235 : vector<2x32xf32>
    %274 = arith.mulf %268, %272 : vector<2x32xf32>
    %275 = arith.addf %273, %274 : vector<2x32xf32>
    %276 = math.tanh %275 : vector<2x32xf32>
    %277 = arith.mulf %270, %276 : vector<2x32xf32>
    %278 = tpu.concatenate %277, %257 in 1 : vector<2x32xf32>, vector<2x32xf32> -> vector<2x64xf32>
    %cst_40 = arith.constant dense<0.000000e+00> : vector<2x128xf32>
    %279 = tpu.matmul %278, %3, %cst_40 {dimension_numbers = #tpu.dot_dimension_numbers<[1], [0], [0], [1], [0, 0, 1, 1], [], []>} : vector<2x64xf32>, vector<64x128xf32>, vector<2x128xf32> -> vector<2x128xf32>
    %280 = vector.broadcast %4 : vector<1x128xf32> to vector<2x128xf32>
    %281 = arith.addf %279, %280 : vector<2x128xf32>
    %282 = vector.extract_strided_slice %281 {offsets = [0, 0], sizes = [2, 96], strides = [1, 1]} : vector<2x128xf32> to vector<2x96xf32>
    %283 = arith.negf %282 : vector<2x96xf32>
    %284 = math.exp %283 : vector<2x96xf32>
    %cst_41 = arith.constant 1.000000e+00 : f32
    %285 = vector.broadcast %cst_41 : f32 to vector<2x96xf32>
    %286 = arith.addf %285, %284 : vector<2x96xf32>
    %287 = arith.divf %285, %286 : vector<2x96xf32>
    %288 = vector.extract_strided_slice %287 {offsets = [0, 0], sizes = [2, 32], strides = [1, 1]} : vector<2x96xf32> to vector<2x32xf32>
    %289 = vector.extract_strided_slice %287 {offsets = [0, 32], sizes = [2, 32], strides = [1, 1]} : vector<2x96xf32> to vector<2x32xf32>
    %290 = vector.extract_strided_slice %287 {offsets = [0, 64], sizes = [2, 32], strides = [1, 1]} : vector<2x96xf32> to vector<2x32xf32>
    %291 = vector.extract_strided_slice %281 {offsets = [0, 96], sizes = [2, 32], strides = [1, 1]} : vector<2x128xf32> to vector<2x32xf32>
    %292 = math.tanh %291 : vector<2x32xf32>
    %293 = arith.mulf %289, %255 : vector<2x32xf32>
    %294 = arith.mulf %288, %292 : vector<2x32xf32>
    %295 = arith.addf %293, %294 : vector<2x32xf32>
    %296 = math.tanh %295 : vector<2x32xf32>
    %297 = arith.mulf %290, %296 : vector<2x32xf32>
    %298 = vector.extract_strided_slice %13 {offsets = [0, 7, 0], sizes = [2, 1, 128], strides = [1, 1, 1]} : vector<2x8x128xf32> to vector<2x1x128xf32>
    %299 = vector.shape_cast %298 : vector<2x1x128xf32> to vector<2x128xf32>
    %cst_42 = arith.constant dense<0.000000e+00> : vector<2x128xf32>
    %300 = tpu.matmul %277, %1, %cst_42 {dimension_numbers = #tpu.dot_dimension_numbers<[1], [0], [0], [1], [0, 0, 1, 1], [], []>} : vector<2x32xf32>, vector<32x128xf32>, vector<2x128xf32> -> vector<2x128xf32>
    %301 = arith.addf %299, %300 : vector<2x128xf32>
    %302 = vector.extract_strided_slice %301 {offsets = [0, 0], sizes = [2, 96], strides = [1, 1]} : vector<2x128xf32> to vector<2x96xf32>
    %303 = arith.negf %302 : vector<2x96xf32>
    %304 = math.exp %303 : vector<2x96xf32>
    %cst_43 = arith.constant 1.000000e+00 : f32
    %305 = vector.broadcast %cst_43 : f32 to vector<2x96xf32>
    %306 = arith.addf %305, %304 : vector<2x96xf32>
    %307 = arith.divf %305, %306 : vector<2x96xf32>
    %308 = vector.extract_strided_slice %307 {offsets = [0, 0], sizes = [2, 32], strides = [1, 1]} : vector<2x96xf32> to vector<2x32xf32>
    %309 = vector.extract_strided_slice %307 {offsets = [0, 32], sizes = [2, 32], strides = [1, 1]} : vector<2x96xf32> to vector<2x32xf32>
    %310 = vector.extract_strided_slice %307 {offsets = [0, 64], sizes = [2, 32], strides = [1, 1]} : vector<2x96xf32> to vector<2x32xf32>
    %311 = vector.extract_strided_slice %301 {offsets = [0, 96], sizes = [2, 32], strides = [1, 1]} : vector<2x128xf32> to vector<2x32xf32>
    %312 = math.tanh %311 : vector<2x32xf32>
    %313 = arith.mulf %309, %275 : vector<2x32xf32>
    %314 = arith.mulf %308, %312 : vector<2x32xf32>
    %315 = arith.addf %313, %314 : vector<2x32xf32>
    %316 = math.tanh %315 : vector<2x32xf32>
    %317 = arith.mulf %310, %316 : vector<2x32xf32>
    %318 = tpu.concatenate %317, %297 in 1 : vector<2x32xf32>, vector<2x32xf32> -> vector<2x64xf32>
    %cst_44 = arith.constant dense<0.000000e+00> : vector<2x128xf32>
    %319 = tpu.matmul %318, %3, %cst_44 {dimension_numbers = #tpu.dot_dimension_numbers<[1], [0], [0], [1], [0, 0, 1, 1], [], []>} : vector<2x64xf32>, vector<64x128xf32>, vector<2x128xf32> -> vector<2x128xf32>
    %320 = vector.broadcast %4 : vector<1x128xf32> to vector<2x128xf32>
    %321 = arith.addf %319, %320 : vector<2x128xf32>
    %322 = vector.extract_strided_slice %321 {offsets = [0, 0], sizes = [2, 96], strides = [1, 1]} : vector<2x128xf32> to vector<2x96xf32>
    %323 = arith.negf %322 : vector<2x96xf32>
    %324 = math.exp %323 : vector<2x96xf32>
    %cst_45 = arith.constant 1.000000e+00 : f32
    %325 = vector.broadcast %cst_45 : f32 to vector<2x96xf32>
    %326 = arith.addf %325, %324 : vector<2x96xf32>
    %327 = arith.divf %325, %326 : vector<2x96xf32>
    %328 = vector.extract_strided_slice %327 {offsets = [0, 0], sizes = [2, 32], strides = [1, 1]} : vector<2x96xf32> to vector<2x32xf32>
    %329 = vector.extract_strided_slice %327 {offsets = [0, 32], sizes = [2, 32], strides = [1, 1]} : vector<2x96xf32> to vector<2x32xf32>
    %330 = vector.extract_strided_slice %327 {offsets = [0, 64], sizes = [2, 32], strides = [1, 1]} : vector<2x96xf32> to vector<2x32xf32>
    %331 = vector.extract_strided_slice %321 {offsets = [0, 96], sizes = [2, 32], strides = [1, 1]} : vector<2x128xf32> to vector<2x32xf32>
    %332 = math.tanh %331 : vector<2x32xf32>
    %333 = arith.mulf %329, %295 : vector<2x32xf32>
    %334 = arith.mulf %328, %332 : vector<2x32xf32>
    %335 = arith.addf %333, %334 : vector<2x32xf32>
    %336 = math.tanh %335 : vector<2x32xf32>
    %337 = arith.mulf %330, %336 : vector<2x32xf32>
    %338 = tpu.concatenate %57, %97, %137, %177, %217, %257, %297, %337 in 0 : vector<2x32xf32>, vector<2x32xf32>, vector<2x32xf32>, vector<2x32xf32>, vector<2x32xf32>, vector<2x32xf32>, vector<2x32xf32>, vector<2x32xf32> -> vector<16x32xf32>
    %c0_46 = arith.constant 0 : index
    %c0_47 = arith.constant 0 : index
    %339 = vector.load %arg6[%c0_46, %c0_47] : memref<32x128xf32, #tpu.memory_space<vmem>>, vector<32x128xf32>
    %cst_48 = arith.constant dense<0.000000e+00> : vector<16x128xf32>
    %340 = tpu.matmul %338, %339, %cst_48 {dimension_numbers = #tpu.dot_dimension_numbers<[1], [0], [0], [1], [0, 0, 1, 1], [], []>} : vector<16x32xf32>, vector<32x128xf32>, vector<16x128xf32> -> vector<16x128xf32>
    %c0_49 = arith.constant 0 : index
    %c0_50 = arith.constant 0 : index
    %341 = vector.load %arg7[%c0_49, %c0_50] : memref<1x128xf32, #tpu.memory_space<vmem>>, vector<1x128xf32>
    %342 = vector.broadcast %341 : vector<1x128xf32> to vector<16x128xf32>
    %343 = arith.addf %340, %342 : vector<16x128xf32>
    %cst_51 = arith.constant 0.000000e+00 : f32
    %344 = vector.broadcast %cst_51 : f32 to vector<16x128xf32>
    %345 = arith.maximumf %343, %344 : vector<16x128xf32>
    %c0_52 = arith.constant 0 : index
    %c0_53 = arith.constant 0 : index
    %346 = vector.load %arg8[%c0_52, %c0_53] : memref<16x128xf32, #tpu.memory_space<vmem>>, vector<16x128xf32>
    tpu.vector_store %arg8[%c0_52, %c0_53], %345 {strides = array<i32>} : memref<16x128xf32, #tpu.memory_space<vmem>>, vector<16x128xf32>,
    return
  }
}

</mosaic_0001>

<bundles_post_ra>
// kernel: tpu_custom_call.1
= control target key start
LH: loop header
LB: loop body
LE: loop exit
PB: predicated region body
PF: predicated region fallthrough
CT: control target
= control target key end

     0   :  { %13 = vsyncpa [#allocation3], 0  ;;  %s3707_s0 = inlined_call_operand.hbm [shape: f32[2,8], index: 0, kind: input, shape index: {}]   ;;  %s3708_s1 = inlined_call_operand.vmem [shape: f32[1,128], index: 1, kind: input, shape index: {}]   ;;  %s3709_s2 = inlined_call_operand.hbm [shape: f32[32,128], index: 2, kind: input, shape index: {}]   ;;  %s3710_s3 = inlined_call_operand.vmem [shape: f32[1,128], index: 3, kind: input, shape index: {}]   ;;  %s3711_s4 = inlined_call_operand.hbm [shape: f32[64,128], index: 4, kind: input, shape index: {}]   ;;  %s3712_s5 = inlined_call_operand.vmem [shape: f32[1,128], index: 5, kind: input, shape index: {}]   ;;  %s3713_s6 = inlined_call_operand.hbm [shape: f32[32,128], index: 6, kind: input, shape index: {}]   ;;  %s3714_s7 = inlined_call_operand.vmem [shape: f32[1,128], index: 7, kind: input, shape index: {}]   ;;  %s3715_s8 = inlined_call_operand.hbm [shape: f32[16,128], index: 8, kind: output, shape index: {}]  }
   0x1   :  { %14 = vsyncpa [#allocation6], 0 }
   0x2   :  { %15 = vsyncpa [#allocation9], 0 }
   0x3   :  { %16 = vsyncpa [#allocation4], 0  ;;  %s3149_s27 = smov [#allocation5]   ;;  %s3031_s9 = scalar_lea.hbm %s3709_s2, 512 }
   0x4   :  { %s34_s28 = sshll.u32 %s3149_s27, 4  ;;  %p3032_p0 = scmp.ne.s32.totalorder %s3709_s2, %s3031_s9  ;;  %s35_s28 = int_to_ptr.vmem [resolvable:$true] %s34_s28 }
   0x5   :  { %p3035_p1 = scmp.lt.u32.totalorder %s3031_s9, %s3709_s2 }
   0x7   :  { %p3037_p2 = pnand %p3035_p1, %p3032_p0 }
   0x9   :  { %3040 = shalt.err (!%p3037_p2)
}
   0xa   :  { %s3041_s14 = scalar_lea.vmem %s35_s28, 512  ;;  %p3046_p4 = scmp.lt.s32.totalorder %s35_s28, %s35_s28 }
   0xb   :  { %p3042_p3 = scmp.ne.s32.totalorder %s35_s28, %s3041_s14  ;;  %p3047_p5 = scmp.lt.s32.totalorder %s3041_s14, %s3041_s14 }
   0xd   :  { %p3048_p6 = por %p3047_p5, %p3046_p4 }
   0xf   :  { %p3049_p7 = pnand %p3048_p6, %p3042_p3 }
  0x11   :  { %3052 = shalt.err (!%p3049_p7)
}
  0x12   :  { %s3150_s15 = smov 128   ;;  %s3151_s16 = smov 8  }
  0x13   :  { %40 = dma.hbm_to_vmem [thread:$0]  %s3709_s2, 512, %s35_s28, [#allocation6], %s3150_s15, %s3150_s15, %s3151_s16  }
  0x14   :  { %s3152_s19 = smov [#allocation2]   ;;  %s3153_s21 = smov [#allocation7]  }
  0x15   :  { %s23_s20 = sshll.u32 %s3152_s19, 4  ;;  %s48_s22 = sshll.u32 %s3153_s21, 4  ;;  %s24_s20 = int_to_ptr.vmem [resolvable:$true] %s23_s20  ;;  %s49_s22 = int_to_ptr.vmem [resolvable:$true] %s48_s22 }
  0x16   :  { %s3053_s25 = scalar_lea.hbm %s3707_s0, 32 }
  0x17   :  { %p3054_p8 = scmp.ne.s32.totalorder %s3707_s0, %s3053_s25  ;;  %p3057_p9 = scmp.lt.u32.totalorder %s3053_s25, %s3707_s0 }
  0x19   :  { %p3059_p10 = pnand %p3057_p9, %p3054_p8 }
  0x1b   :  { %3062 = shalt.err (!%p3059_p10)
}
  0x1c   :  { %s3063_s2 = scalar_lea.vmem %s24_s20, 32  ;;  %p3068_p12 = scmp.lt.s32.totalorder %s24_s20, %s24_s20 }
  0x1d   :  { %p3064_p11 = scmp.ne.s32.totalorder %s24_s20, %s3063_s2  ;;  %p3069_p13 = scmp.lt.s32.totalorder %s3063_s2, %s3063_s2 }
  0x1f   :  { %p3070_p0 = por %p3069_p13, %p3068_p12 }
  0x21   :  { %p3071_p1 = pnand %p3070_p0, %p3064_p11 }
  0x23   :  { %3074 = shalt.err (!%p3071_p1)
}
  0x24   :  { %26 = dma.hbm_to_vmem [thread:$0]  %s3707_s0, 32, %s24_s20, [#allocation3]  }
  0x25   :  { %s3075_s12 = scalar_lea.hbm %s3711_s4, 1024 }
  0x26   :  { %p3076_p2 = scmp.ne.s32.totalorder %s3711_s4, %s3075_s12  ;;  %p3079_p3 = scmp.lt.u32.totalorder %s3075_s12, %s3711_s4 }
  0x28   :  { %p3081_p4 = pnand %p3079_p3, %p3076_p2 }
  0x2a   :  { %3084 = shalt.err (!%p3081_p4)
}
  0x2b   :  { %s3085_s19 = scalar_lea.vmem %s49_s22, 1024  ;;  %p3090_p6 = scmp.lt.s32.totalorder %s49_s22, %s49_s22 }
  0x2c   :  { %p3086_p5 = scmp.ne.s32.totalorder %s49_s22, %s3085_s19  ;;  %p3091_p7 = scmp.lt.s32.totalorder %s3085_s19, %s3085_s19 }
  0x2e   :  { %p3092_p8 = por %p3091_p7, %p3090_p6 }
  0x30   :  { %p3093_p9 = pnand %p3092_p8, %p3086_p5 }
  0x32   :  { %3096 = shalt.err (!%p3093_p9)
}
  0x33   :  { %54 = dma.hbm_to_vmem [thread:$0]  %s3711_s4, 1024, %s49_s22, [#allocation6], %s3150_s15, %s3150_s15, %s3151_s16  }
  0x34   :  { %s3154_s21 = smov [#allocation8]   ;;  %s3097_s26 = scalar_lea.hbm %s3713_s6, 512 }
  0x35   :  { %s62_s23 = sshll.u32 %s3154_s21, 4  ;;  %p3098_p10 = scmp.ne.s32.totalorder %s3713_s6, %s3097_s26  ;;  %s63_s23 = int_to_ptr.vmem [resolvable:$true] %s62_s23 }
  0x36   :  { %p3101_p11 = scmp.lt.u32.totalorder %s3097_s26, %s3713_s6 }
  0x38   :  { %p3103_p12 = pnand %p3101_p11, %p3098_p10 }
  0x3a   :  { %3106 = shalt.err (!%p3103_p12)
}
  0x3b   :  { %s3107_s28 = scalar_lea.vmem %s63_s23, 512  ;;  %p3112_p0 = scmp.lt.s32.totalorder %s63_s23, %s63_s23 }
  0x3c   :  { %p3108_p13 = scmp.ne.s32.totalorder %s63_s23, %s3107_s28  ;;  %p3113_p1 = scmp.lt.s32.totalorder %s3107_s28, %s3107_s28 }
  0x3e   :  { %p3114_p2 = por %p3113_p1, %p3112_p0 }
  0x40   :  { %p3115_p3 = pnand %p3114_p2, %p3108_p13 }
  0x42   :  { %3118 = shalt.err (!%p3115_p3)
}
  0x43   :  { %68 = dma.hbm_to_vmem [thread:$0]  %s3713_s6, 512, %s63_s23, [#allocation9], %s3150_s15, %s3150_s15, %s3151_s16  }
  0x44   :  { %3141 = dma.done.wait [#allocation3], 32  }
  0x45   :  { %3142 = vsyncadd [#allocation3], 4294967264 }
  0x46   :  { %3143 = dma.done.wait [#allocation6], 1536  }
  0x47   :  { %3144 = vsyncadd [#allocation6], 4294965760 }
  0x48   :  { %3145 = dma.done.wait [#allocation9], 512  }
  0x49   :  { %3146 = vsyncadd [#allocation9], 4294966784  ;;  %v99_v0 = vlaneseq  ;;  %v3155_v1 = vmov 0.0|0.0   ;;  %vm3156_vm0 = vmmov 0   ;;  %v3157_v2 = vmov 0.0   ;;  %v84_v5 = vld [vmem:[#allocation5] sm:$0xff] }
  0x4a   :  { %2673 = vmatprep.subr.bf16.mxu0 %v3155_v1  ;;  %2430 = vmatprep.mubr.msk.f32.mxu0 %vm3156_vm0, %v3157_v2  ;;  %v85_v6 = vld [vmem:[#allocation5 + $0x8] sm:$0xff]  ;;  %v86_v7 = vld [vmem:[#allocation5 + $0x10] sm:$0xff]  ;;  %v87_v10 = vld [vmem:[#allocation5 + $0x18] sm:$0xff]  ;;  %vm260_vm1 = vcmask 1041409   ;;  %vm129_vm2 = vcmask 261120   ;;  %vm272_vm3 = vcmask 523264  }
  0x4b   :  { %v100_v3 = vshrl.u32 %v99_v0, 7  ;;  %2679 = vmatprep.subr.bf16.mxu1 %v3155_v1  ;;  %2449 = vmatprep.mubr.msk.f32.mxu1 %vm3156_vm0, %v3157_v2  ;;  %v3270_v9 = vpack.c.bf16 %v85_v6, %v84_v5  ;;  %v98_v11 = vld [vmem:[#allocation2] sm:$0x3]  ;;  %v3273_v13 = vpack.c.bf16 %v87_v10, %v86_v7  ;;  %v89_v48 = vld [vmem:[#allocation7] sm:$0xff]  ;;  %v90_v49 = vld [vmem:[#allocation7 + $0x8] sm:$0xff]  ;;  %vm505_vm4 = vcmask 1042434  }
  0x4c   :  { %v2259_v16 = vld [vmem:[%s3708_s1] ss:$0 sm:$0xff]  ;;  %s3158_s1 = smov 32   ;;  %v91_v50 = vld [vmem:[#allocation7 + $0x10] sm:$0xff]  ;;  %v3307_v51 = vpack.c.bf16 %v90_v49, %v89_v48  ;;  %v93_v54 = vld [vmem:[#allocation7 + $0x20] sm:$0xff]  ;;  %s3160_s14 = smov 96  }
  0x4d   :  { %v108_v4 = vsub.s32 1, %v100_v3  ;;  %v101_v8 = vsub.s32 0, %v100_v3  ;;  %2675 = vmatpush3.bf16.msra.mxu0 %v3270_v9  ;;  %v2260_v19 = vld [vmem:[%s3710_s3] ss:$0 sm:$0xff]  ;;  %v94_v55 = vld [vmem:[#allocation7 + $0x28] sm:$0xff]  ;;  %v95_v58 = vld [vmem:[#allocation7 + $0x30] sm:$0xff] }
  0x4e   :  { %2676 = vmatprep.subr.bf16.mxu0 %v3155_v1  ;;  %v92_v52 = vld [vmem:[#allocation7 + $0x18] sm:$0xff]  ;;  %2681 = vmatpush3.bf16.msra.mxu1 %v3307_v51  ;;  %v3315_v57 = vpack.c.bf16 %v94_v55, %v93_v54  ;;  %s3159_s3 = smov 64   ;;  %vm754_vm5 = vcmask 1043459   ;;  %vm1004_vm6 = vcmask 1044484   ;;  %vm2131_vm7 = vcmask 1041408   ;;  %s3161_s0 = smov [#allocation10]  }
  0x4f   :  { %v109_v12 = vrot.slane %v98_v11, %v108_v4  ;;  %v102_v14 = vrot.slane %v98_v11, %v101_v8  ;;  %v3310_v53 = vpack.c.bf16 %v92_v52, %v91_v50  ;;  %2682 = vmatprep.subr.bf16.mxu1 %v3155_v1  ;;  %v96_v59 = vld [vmem:[#allocation7 + $0x38] sm:$0xff]  ;;  %vm2133_vm8 = vcmask 1043456   ;;  %s2245_s20 = sshll.u32 %s3161_s0, 4  ;;  %s2246_s20 = int_to_ptr.vmem [resolvable:$true] %s2245_s20 }
  0x50   :  { %v3320_v61 = vpack.c.bf16 %v96_v59, %v95_v58  ;;  %vm1254_vm9 = vcmask 1045509   ;;  %vm2135_vm10 = vcmask 1045504   ;;  %vm1504_vm11 = vcmask 1046534   ;;  %s3119_s21 = scalar_lea.vmem %s2246_s20, 256  ;;  %p3124_p5 = scmp.lt.s32.totalorder %s2246_s20, %s2246_s20 }
  0x51   :  { %111 = vbcast.lane.b32.xlu0 %v109_v12, 256  ;;  %2678 = vmatpush3.bf16.msra.mxu0 %v3273_v13  ;;  %vm1754_vm12 = vcmask 1047559   ;;  %vm2019_vm13 = vcmask 1040384   ;;  %p3120_p4 = scmp.ne.s32.totalorder %s2246_s20, %s3119_s21  ;;  %p3125_p6 = scmp.lt.s32.totalorder %s3119_s21, %s3119_s21 }
  0x52   :  { %2691 = vmatprep.subr.bf16.mxu0 %v3155_v1  ;;  %2684 = vmatpush3.bf16.msra.mxu1 %v3310_v53 }
  0x53   :  { %2685 = vmatprep.subr.bf16.mxu1 %v3155_v1  ;;  %p3126_p7 = por %p3125_p6, %p3124_p5 }
  0x54   :  { %2431 = vmatmul.mubr.f32.vlgmr.msra.gmra.mrb[0].mxu0 %v3157_v2 }
  0x55   :  { %104 = vbcast.lane.b32.xlu0 %v102_v14, 256  ;;  %2693 = vmatpush3.bf16.msra.mxu0 %v3270_v9  ;;  %p3127_p8 = pnand %p3126_p7, %p3120_p4 }
  0x56   :  { %2460 = vmatprep.mubr.msk.f32.mxu0 %vm3156_vm0, %v3157_v2  ;;  %2694 = vmatprep.subr.bf16.mxu0 %v3155_v1 }
  0x57   :  { %2687 = vmatpush3.bf16.msra.mxu1 %v3315_v57 }
  0x58   :  { %2688 = vmatprep.subr.bf16.mxu1 %v3155_v1 }
  0x59   :  { %2696 = vmatpush3.bf16.msra.mxu0 %v3273_v13 }
  0x5a   :  { %2697 = vmatprep.subr.bf16.mxu0 %v3155_v1 }
  0x5b   :  { %2690 = vmatpush3.bf16.msra.mxu1 %v3320_v61 }
  0x5c   :  { %2709 = vmatprep.subr.bf16.mxu1 %v3155_v1 }
  0xc3   :  { %v112_v15 = vpop.permute.xlu0 %111 }
  0xc4   :  { %v120_v17 = vmul.f32 %v2259_v16, %v112_v15 }
  0xc6   :  { %v3291_v21 = vadd.f32 %v2260_v19, %v120_v17  ;;  %v3351_v17 = vld [vmem:[%s3712_s5] ss:$0 sm:$0xff] }
  0xc7   :  { %v105_v18 = vpop.permute.xlu0 %104 }
  0xc8   :  { %v119_v20 = vmul.f32 %v2259_v16, %v105_v18 }
  0xca   :  { %v3293_v25 = vadd.f32 %v2260_v19, %v119_v20 }
 0x127   :  { %v199_v22 = vpop.f32.mrb[0].mxu0 }
 0x128   :  { %v204_v23 = vrot.slane %v199_v22, 1  ;;  %v2432_v24 = vpop.f32.mrb[1].mxu0  ;;  %v207_v27 = vadd.f32 %v199_v22, %v3293_v25 }
 0x12a   :  { %v208_v26 = vadd.f32 %v204_v23, %v3291_v21  ;;  %v2261_v31 = vmul.f32 -1.442695, %v207_v27 }
 0x12c   :  { %2838 = vtanh.f32 %v208_v26  ;;  %v2262_v30 = vmul.f32 -1.442695, %v208_v26 }
 0x12d   :  { %2840 = vtanh.f32 %v207_v27 }
 0x12e   :  { %2842 = vpow2.f32 %v2262_v30 }
 0x12f   :  { %2844 = vpow2.f32 %v2261_v31 }
 0x136   :  { %v2839_v28 = vpop.eup %2838 }
 0x137   :  { %229 = vrot.lane.b32.xlu1 %v2839_v28, %s3158_s1  ;;  %v2841_v29 = vpop.eup %2840 }
 0x138   :  { %v2843_v32 = vpop.eup %2842 }
 0x139   :  { %v216_v33 = vadd.f32 1.0, %v2843_v32  ;;  %v2845_v34 = vpop.eup %2844 }
 0x13a   :  { %v215_v35 = vadd.f32 1.0, %v2845_v34 }
 0x13b   :  { %227 = vrot.lane.b32.xlu1 %v2841_v29, %s3158_s1  ;;  %2846 = vrcp.f32 %v216_v33 }
 0x13c   :  { %2848 = vrcp.f32 %v215_v35 }
 0x145   :  { %v2847_v36 = vpop.eup %2846 }
 0x146   :  { %v2849_v39 = vpop.eup %2848  ;;  %v224_v42 = vmul.f32 0.0, %v2847_v36 }
 0x147   :  { %v223_v45 = vmul.f32 0.0, %v2849_v39 }
 0x1a9   :  { %v230_v37 = vpop.permute.xlu1 %229 }
 0x1aa   :  { %v234_v38 = vmul.f32 %v2847_v36, %v230_v37 }
 0x1ac   :  { %239 = vrot.lane.b32.xlu0 %v234_v38, %s3158_s1 }
 0x1ad   :  { %v228_v40 = vpop.permute.xlu1 %227 }
 0x1ae   :  { %v233_v41 = vmul.f32 %v2849_v39, %v228_v40 }
 0x1b0   :  { %237 = vrot.lane.b32.xlu1 %v233_v41, %s3158_s1 }
 0x21e   :  { %v240_v43 = vpop.permute.xlu0 %239 }
 0x21f   :  { %v3301_v44 = vadd.f32 %v240_v43, %v224_v42 }
 0x221   :  { %2850 = vtanh.f32 %v3301_v44  ;;  %v465_v42 = vrot.slane %v3301_v44, 7 }
 0x222   :  { %v238_v46 = vpop.permute.xlu1 %237 }
 0x223   :  { %v3304_v47 = vadd.f32 %v238_v46, %v223_v45 }
 0x225   :  { %2852 = vtanh.f32 %v3304_v47  ;;  %v464_v45 = vrot.slane %v3304_v47, 7 }
 0x22b   :  { %v2851_v56 = vpop.eup %2850 }
 0x22c   :  { %251 = vrot.lane.b32.xlu0 %v2851_v56, %s3158_s1 }
 0x22f   :  { %v2853_v60 = vpop.eup %2852 }
 0x230   :  { %249 = vrot.lane.b32.xlu1 %v2853_v60, %s3158_s1 }
 0x29e   :  { %v252_v62 = vpop.permute.xlu0 %251 }
 0x29f   :  { %v256_v63 = vmul.f32 %v2847_v36, %v252_v62 }
 0x2a1   :  { %v259_v3 = vrot.slane %v256_v63, 7 }
 0x2a2   :  { %v250_v0 = vpop.permute.xlu1 %249 }
 0x2a3   :  { %v255_v4 = vmul.f32 %v2849_v39, %v250_v0 }
 0x2a5   :  { %v261_v5 = vsel %vm260_vm1, %v259_v3, %v255_v4 }
 0x2a6   :  { %262 = vrot.lane.b32.xlu0 %v261_v5, %s3159_s3 }
 0x318   :  { %v263_v6 = vpop.permute.xlu0 %262 }
 0x319   :  { %v265_v7 = vsel %vm129_vm2, %v263_v6, 0.0  ;;  %2461 = vmatmul.mubr.msk.f32.vlgmr.msra.gmra.mrb[2].mxu0 %vm129_vm2, %v263_v6 }
 0x31a   :  { %2450 = vmatmul.mubr.msk.f32.vlgmr.msra.gmra.mrb[0].mxu1 %vm272_vm3, %v265_v7  ;;  %2699 = vmatpush3.bf16.msra.mxu0 %v3307_v51 }
 0x31b   :  { %2700 = vmatprep.subr.bf16.mxu0 %v3155_v1  ;;  %2711 = vmatpush3.bf16.msra.mxu1 %v3270_v9 }
 0x31c   :  { %2712 = vmatprep.subr.bf16.mxu1 %v3155_v1  ;;  %2490 = vmatprep.mubr.msk.f32.mxu1 %vm3156_vm0, %v3157_v2 }
 0x31d   :  { %2479 = vmatprep.mubr.msk.f32.mxu0 %vm3156_vm0, %v3157_v2 }
 0x31e   :  { %2702 = vmatpush3.bf16.msra.mxu0 %v3310_v53 }
 0x31f   :  { %2703 = vmatprep.subr.bf16.mxu0 %v3155_v1  ;;  %2714 = vmatpush3.bf16.msra.mxu1 %v3273_v13 }
 0x320   :  { %2715 = vmatprep.subr.bf16.mxu1 %v3155_v1 }
 0x322   :  { %2705 = vmatpush3.bf16.msra.mxu0 %v3315_v57 }
 0x323   :  { %2706 = vmatprep.subr.bf16.mxu0 %v3155_v1 }
 0x326   :  { %2708 = vmatpush3.bf16.msra.mxu0 %v3320_v61 }
 0x327   :  { %2727 = vmatprep.subr.bf16.mxu0 %v3155_v1 }
 0x3ec   :  { %v438_v8 = vpop.f32.mrb[2].mxu0 }
 0x3ed   :  { %v443_v10 = vrot.slane %v438_v8, 7  ;;  %v447_v11 = vadd.f32 %v438_v8, %v3291_v21  ;;  %v342_v12 = vpop.f32.mrb[0].mxu1  ;;  %v2462_v14 = vpop.f32.mrb[3].mxu0 }
 0x3ee   :  { %v2451_v15 = vpop.f32.mrb[1].mxu1  ;;  %v343_v18 = vadd.f32 %v3351_v17, %v342_v12 }
 0x3ef   :  { %v446_v16 = vadd.f32 %v443_v10, %v3293_v25  ;;  %2854 = vtanh.f32 %v447_v11  ;;  %v2268_v23 = vmul.f32 -1.442695, %v447_v11 }
 0x3f0   :  { %v2265_v26 = vmul.f32 -1.442695, %v343_v18 }
 0x3f1   :  { %2856 = vtanh.f32 %v446_v16  ;;  %v2267_v24 = vmul.f32 -1.442695, %v446_v16 }
 0x3f2   :  { %2858 = vtanh.f32 %v343_v18 }
 0x3f3   :  { %2860 = vpow2.f32 %v2268_v23 }
 0x3f4   :  { %2862 = vpow2.f32 %v2267_v24 }
 0x3f5   :  { %2864 = vpow2.f32 %v2265_v26 }
 0x3f9   :  { %v2855_v19 = vpop.eup %2854 }
 0x3fa   :  { %474 = vrot.lane.b32.xlu0 %v2855_v19, %s3158_s1 }
 0x3fb   :  { %v2857_v20 = vpop.eup %2856 }
 0x3fc   :  { %472 = vrot.lane.b32.xlu1 %v2857_v20, %s3158_s1  ;;  %v2859_v22 = vpop.eup %2858 }
 0x3fd   :  { %v2861_v27 = vpop.eup %2860 }
 0x3fe   :  { %v2863_v28 = vpop.eup %2862  ;;  %v455_v29 = vadd.f32 1.0, %v2861_v27 }
 0x3ff   :  { %v454_v30 = vadd.f32 1.0, %v2863_v28  ;;  %v2865_v31 = vpop.eup %2864 }
 0x400   :  { %355 = vrot.lane.b32.xlu1 %v2859_v22, %s3158_s1  ;;  %2866 = vrcp.f32 %v455_v29  ;;  %v349_v32 = vadd.f32 1.0, %v2865_v31 }
 0x401   :  { %2868 = vrcp.f32 %v454_v30 }
 0x402   :  { %2870 = vrcp.f32 %v349_v32 }
 0x40a   :  { %v2867_v33 = vpop.eup %2866 }
 0x40b   :  { %v2869_v36 = vpop.eup %2868  ;;  %v469_v43 = vmul.f32 %v2867_v33, %v465_v42 }
 0x40c   :  { %v2871_v39 = vpop.eup %2870  ;;  %v468_v49 = vmul.f32 %v2869_v36, %v464_v45 }
 0x40d   :  { %v353_v54 = vmul.f32 0.0, %v2871_v39 }
 0x46c   :  { %v475_v34 = vpop.permute.xlu0 %474 }
 0x46d   :  { %v479_v35 = vmul.f32 %v2867_v33, %v475_v34 }
 0x46e   :  { %v473_v37 = vpop.permute.xlu1 %472 }
 0x46f   :  { %484 = vrot.lane.b32.xlu1 %v479_v35, %s3158_s1  ;;  %v478_v38 = vmul.f32 %v2869_v36, %v473_v37 }
 0x471   :  { %482 = vrot.lane.b32.xlu0 %v478_v38, %s3158_s1 }
 0x472   :  { %v356_v40 = vpop.permute.xlu1 %355 }
 0x473   :  { %v358_v41 = vmul.f32 %v2871_v39, %v356_v40 }
 0x475   :  { %360 = vrot.lane.b32.xlu0 %v358_v41, %s3158_s1 }
 0x4e1   :  { %v485_v46 = vpop.permute.xlu1 %484 }
 0x4e2   :  { %v3362_v48 = vadd.f32 %v485_v46, %v469_v43 }
 0x4e3   :  { %v483_v50 = vpop.permute.xlu0 %482 }
 0x4e4   :  { %2872 = vtanh.f32 %v3362_v48  ;;  %v3365_v52 = vadd.f32 %v483_v50, %v468_v49 }
 0x4e6   :  { %2874 = vtanh.f32 %v3365_v52 }
 0x4e7   :  { %v361_v55 = vpop.permute.xlu0 %360 }
 0x4e8   :  { %v3368_v56 = vadd.f32 %v361_v55, %v353_v54  ;;  %v713_v55 = vrot.slane %v3365_v52, 7 }
 0x4ea   :  { %2876 = vtanh.f32 %v3368_v56 }
 0x4ee   :  { %v2873_v44 = vpop.eup %2872 }
 0x4ef   :  { %496 = vrot.lane.b32.xlu0 %v2873_v44, %s3158_s1  ;;  %v714_v44 = vrot.slane %v3362_v48, 7 }
 0x4f0   :  { %v2875_v47 = vpop.eup %2874 }
 0x4f1   :  { %494 = vrot.lane.b32.xlu1 %v2875_v47, %s3158_s1 }
 0x4f4   :  { %v2877_v58 = vpop.eup %2876 }
 0x4f5   :  { %366 = vrot.lane.b32.xlu1 %v2877_v58, %s3158_s1 }
 0x561   :  { %v497_v59 = vpop.permute.xlu0 %496 }
 0x562   :  { %v501_v60 = vmul.f32 %v2867_v33, %v497_v59 }
 0x563   :  { %v495_v63 = vpop.permute.xlu1 %494 }
 0x564   :  { %v504_v62 = vrot.slane %v501_v60, 7  ;;  %v500_v0 = vmul.f32 %v2869_v36, %v495_v63 }
 0x566   :  { %v614_v3 = vrot.slane %v500_v0, 1  ;;  %v506_v4 = vsel %vm505_vm4, %v504_v62, %v500_v0 }
 0x567   :  { %507 = vrot.lane.b32.xlu0 %v506_v4, %s3159_s3  ;;  %v367_v5 = vpop.permute.xlu1 %366 }
 0x568   :  { %v3375_v6 = vmul.f32 %v2871_v39, %v367_v5  ;;  %v615_v8 = vsel %vm260_vm1, %v501_v60, %v614_v3 }
 0x56a   :  { %v511_v7 = vrot.slane %v3375_v6, 7 }
 0x56b   :  { %616 = vrot.lane.b32.xlu0 %v615_v8, %s3159_s3 }
 0x56c   :  { %512 = vrot.lane.b32.xlu1 %v511_v7, %s3160_s14 }
 0x5d9   :  { %v508_v10 = vpop.permute.xlu0 %507 }
 0x5dd   :  { %v617_v11 = vpop.permute.xlu0 %616 }
 0x5de   :  { %2491 = vmatmul.mubr.msk.f32.vlgmr.msra.gmra.mrb[2].mxu1 %vm129_vm2, %v617_v11  ;;  %v513_v12 = vpop.permute.xlu1 %512 }
 0x5df   :  { %v515_v14 = vsel %vm129_vm2, %v508_v10, %v513_v12  ;;  %2717 = vmatpush3.bf16.msra.mxu1 %v3307_v51  ;;  %2509 = vmatprep.mubr.msk.f32.mxu1 %vm3156_vm0, %v3157_v2 }
 0x5e0   :  { %v517_v15 = vrot.slane %v515_v14, 1  ;;  %2718 = vmatprep.subr.bf16.mxu1 %v3155_v1 }
 0x5e2   :  { %2480 = vmatmul.mubr.msk.f32.vlgmr.msra.gmra.mrb[4].mxu0 %vm272_vm3, %v517_v15 }
 0x5e3   :  { %2720 = vmatpush3.bf16.msra.mxu1 %v3310_v53  ;;  %2729 = vmatpush3.bf16.msra.mxu0 %v3270_v9 }
 0x5e4   :  { %2721 = vmatprep.subr.bf16.mxu1 %v3155_v1  ;;  %2730 = vmatprep.subr.bf16.mxu0 %v3155_v1 }
 0x5e5   :  { %2520 = vmatprep.mubr.msk.f32.mxu0 %vm3156_vm0, %v3157_v2 }
 0x5e7   :  { %2723 = vmatpush3.bf16.msra.mxu1 %v3315_v57  ;;  %2732 = vmatpush3.bf16.msra.mxu0 %v3273_v13 }
 0x5e8   :  { %2724 = vmatprep.subr.bf16.mxu1 %v3155_v1  ;;  %2733 = vmatprep.subr.bf16.mxu0 %v3155_v1 }
 0x5eb   :  { %2726 = vmatpush3.bf16.msra.mxu1 %v3320_v61 }
 0x5ec   :  { %2745 = vmatprep.subr.bf16.mxu1 %v3155_v1 }
 0x6b1   :  { %v686_v16 = vpop.f32.mrb[2].mxu1 }
 0x6b2   :  { %v691_v18 = vrot.slane %v686_v16, 6  ;;  %v692_v19 = vrot.slane %v686_v16, 7  ;;  %v2492_v20 = vpop.f32.mrb[3].mxu1 }
 0x6b4   :  { %v695_v22 = vadd.f32 %v691_v18, %v3293_v25  ;;  %v696_v23 = vadd.f32 %v692_v19, %v3291_v21 }
 0x6b5   :  { %v586_v24 = vpop.f32.mrb[4].mxu0 }
 0x6b6   :  { %2878 = vtanh.f32 %v695_v22  ;;  %v2481_v26 = vpop.f32.mrb[5].mxu0  ;;  %v587_v27 = vadd.f32 %v3351_v17, %v586_v24  ;;  %v2272_v31 = vmul.f32 -1.442695, %v695_v22  ;;  %v2273_v32 = vmul.f32 -1.442695, %v696_v23 }
 0x6b7   :  { %2880 = vtanh.f32 %v696_v23 }
 0x6b8   :  { %2882 = vtanh.f32 %v587_v27  ;;  %v2270_v33 = vmul.f32 -1.442695, %v587_v27 }
 0x6b9   :  { %2884 = vpow2.f32 %v2272_v31 }
 0x6ba   :  { %2886 = vpow2.f32 %v2273_v32 }
 0x6bb   :  { %2888 = vpow2.f32 %v2270_v33 }
 0x6c0   :  { %v2879_v28 = vpop.eup %2878 }
 0x6c1   :  { %v2881_v29 = vpop.eup %2880  ;;  %721 = vrot.lane.b32.xlu1 %v2879_v28, %s3158_s1 }
 0x6c2   :  { %723 = vrot.lane.b32.xlu0 %v2881_v29, %s3158_s1  ;;  %v2883_v30 = vpop.eup %2882 }
 0x6c3   :  { %v2885_v34 = vpop.eup %2884 }
 0x6c4   :  { %v2887_v35 = vpop.eup %2886  ;;  %v703_v36 = vadd.f32 1.0, %v2885_v34 }
 0x6c5   :  { %599 = vrot.lane.b32.xlu1 %v2883_v30, %s3158_s1  ;;  %v704_v37 = vadd.f32 1.0, %v2887_v35  ;;  %v2889_v38 = vpop.eup %2888 }
 0x6c6   :  { %2890 = vrcp.f32 %v703_v36  ;;  %v593_v39 = vadd.f32 1.0, %v2889_v38 }
 0x6c7   :  { %2892 = vrcp.f32 %v704_v37 }
 0x6c8   :  { %2894 = vrcp.f32 %v593_v39 }
 0x6d0   :  { %v2891_v40 = vpop.eup %2890 }
 0x6d1   :  { %v2893_v42 = vpop.eup %2892  ;;  %v717_v47 = vmul.f32 %v2891_v40, %v713_v55 }
 0x6d2   :  { %v2895_v49 = vpop.eup %2894  ;;  %v718_v58 = vmul.f32 %v2893_v42, %v714_v44 }
 0x6d3   :  { %v597_v0 = vmul.f32 %v2895_v49, %v3368_v56 }
 0x733   :  { %v722_v41 = vpop.permute.xlu1 %721 }
 0x734   :  { %v724_v43 = vpop.permute.xlu0 %723  ;;  %v727_v45 = vmul.f32 %v2891_v40, %v722_v41 }
 0x735   :  { %v728_v46 = vmul.f32 %v2893_v42, %v724_v43 }
 0x736   :  { %731 = vrot.lane.b32.xlu0 %v727_v45, %s3158_s1 }
 0x737   :  { %733 = vrot.lane.b32.xlu1 %v728_v46, %s3158_s1  ;;  %v600_v50 = vpop.permute.xlu1 %599 }
 0x738   :  { %v602_v54 = vmul.f32 %v2895_v49, %v600_v50 }
 0x73a   :  { %604 = vrot.lane.b32.xlu0 %v602_v54, %s3158_s1 }
 0x7a8   :  { %v732_v59 = vpop.permute.xlu0 %731 }
 0x7a9   :  { %v734_v60 = vpop.permute.xlu1 %733  ;;  %v3411_v62 = vadd.f32 %v732_v59, %v717_v47 }
 0x7aa   :  { %v3413_v63 = vadd.f32 %v734_v60, %v718_v58 }
 0x7ab   :  { %2896 = vtanh.f32 %v3411_v62 }
 0x7ac   :  { %2898 = vtanh.f32 %v3413_v63  ;;  %v605_v3 = vpop.permute.xlu0 %604 }
 0x7ad   :  { %v3418_v4 = vadd.f32 %v605_v3, %v597_v0 }
 0x7af   :  { %2900 = vtanh.f32 %v3418_v4 }
 0x7b5   :  { %v2897_v48 = vpop.eup %2896 }
 0x7b6   :  { %v2899_v52 = vpop.eup %2898  ;;  %743 = vrot.lane.b32.xlu1 %v2897_v48, %s3158_s1 }
 0x7b7   :  { %745 = vrot.lane.b32.xlu0 %v2899_v52, %s3158_s1  ;;  %v963_v52 = vrot.slane %v3411_v62, 7 }
 0x7b9   :  { %v2901_v5 = vpop.eup %2900 }
 0x7ba   :  { %610 = vrot.lane.b32.xlu1 %v2901_v5, %s3158_s1  ;;  %v964_v5 = vrot.slane %v3413_v63, 7 }
 0x828   :  { %v744_v7 = vpop.permute.xlu1 %743 }
 0x829   :  { %v746_v8 = vpop.permute.xlu0 %745  ;;  %v749_v11 = vmul.f32 %v2891_v40, %v744_v7 }
 0x82a   :  { %v750_v10 = vmul.f32 %v2893_v42, %v746_v8 }
 0x82b   :  { %v863_v15 = vrot.slane %v749_v11, 2 }
 0x82c   :  { %v753_v56 = vrot.slane %v750_v10, 7  ;;  %v611_v12 = vpop.permute.xlu1 %610  ;;  %v864_v14 = vrot.slane %v750_v10, 1 }
 0x82d   :  { %v3424_v16 = vmul.f32 %v2895_v49, %v611_v12 }
 0x82e   :  { %v755_v18 = vsel %vm754_vm5, %v753_v56, %v749_v11  ;;  %v865_v20 = vsel %vm260_vm1, %v864_v14, %v863_v15 }
 0x82f   :  { %756 = vrot.lane.b32.xlu0 %v755_v18, %s3159_s3  ;;  %v760_v19 = vrot.slane %v3424_v16, 6 }
 0x831   :  { %761 = vrot.lane.b32.xlu1 %v760_v19, %s3160_s14 }
 0x833   :  { %866 = vrot.lane.b32.xlu0 %v865_v20, %s3159_s3 }
 0x8a1   :  { %v757_v22 = vpop.permute.xlu0 %756 }
 0x8a3   :  { %v762_v23 = vpop.permute.xlu1 %761 }
 0x8a4   :  { %v764_v24 = vsel %vm129_vm2, %v757_v22, %v762_v23 }
 0x8a5   :  { %v867_v26 = vpop.permute.xlu0 %866  ;;  %v766_v27 = vrot.slane %v764_v24, 2 }
 0x8a6   :  { %2521 = vmatmul.mubr.msk.f32.vlgmr.msra.gmra.mrb[6].mxu0 %vm129_vm2, %v867_v26 }
 0x8a7   :  { %2735 = vmatpush3.bf16.msra.mxu0 %v3307_v51  ;;  %2539 = vmatprep.mubr.msk.f32.mxu0 %vm3156_vm0, %v3157_v2 }
 0x8a8   :  { %2510 = vmatmul.mubr.msk.f32.vlgmr.msra.gmra.mrb[4].mxu1 %vm272_vm3, %v766_v27  ;;  %2736 = vmatprep.subr.bf16.mxu0 %v3155_v1 }
 0x8a9   :  { %2747 = vmatpush3.bf16.msra.mxu1 %v3270_v9  ;;  %2550 = vmatprep.mubr.msk.f32.mxu1 %vm3156_vm0, %v3157_v2 }
 0x8aa   :  { %2748 = vmatprep.subr.bf16.mxu1 %v3155_v1 }
 0x8ab   :  { %2738 = vmatpush3.bf16.msra.mxu0 %v3310_v53 }
 0x8ac   :  { %2739 = vmatprep.subr.bf16.mxu0 %v3155_v1 }
 0x8ad   :  { %2750 = vmatpush3.bf16.msra.mxu1 %v3273_v13 }
 0x8ae   :  { %2751 = vmatprep.subr.bf16.mxu1 %v3155_v1 }
 0x8af   :  { %2741 = vmatpush3.bf16.msra.mxu0 %v3315_v57 }
 0x8b0   :  { %2742 = vmatprep.subr.bf16.mxu0 %v3155_v1 }
 0x8b3   :  { %2744 = vmatpush3.bf16.msra.mxu0 %v3320_v61 }
 0x8b4   :  { %2763 = vmatprep.subr.bf16.mxu0 %v3155_v1 }
 0x979   :  { %v936_v28 = vpop.f32.mrb[6].mxu0 }
 0x97a   :  { %v941_v29 = vrot.slane %v936_v28, 5  ;;  %v942_v30 = vrot.slane %v936_v28, 6  ;;  %v2522_v31 = vpop.f32.mrb[7].mxu0 }
 0x97b   :  { %v835_v32 = vpop.f32.mrb[4].mxu1 }
 0x97c   :  { %v945_v33 = vadd.f32 %v941_v29, %v3293_v25  ;;  %v946_v34 = vadd.f32 %v942_v30, %v3291_v21  ;;  %v2511_v35 = vpop.f32.mrb[5].mxu1  ;;  %v836_v36 = vadd.f32 %v3351_v17, %v835_v32 }
 0x97e   :  { %2902 = vtanh.f32 %v945_v33  ;;  %v2277_v40 = vmul.f32 -1.442695, %v945_v33  ;;  %v2278_v41 = vmul.f32 -1.442695, %v946_v34  ;;  %v2275_v42 = vmul.f32 -1.442695, %v836_v36 }
 0x97f   :  { %2904 = vtanh.f32 %v946_v34  ;;  %v2132_v34 = vsel %vm2131_vm7, %v3375_v6, %v760_v19 }
 0x980   :  { %2906 = vtanh.f32 %v836_v36 }
 0x981   :  { %2908 = vpow2.f32 %v2277_v40 }
 0x982   :  { %2910 = vpow2.f32 %v2278_v41 }
 0x983   :  { %2912 = vpow2.f32 %v2275_v42 }
 0x988   :  { %v2903_v37 = vpop.eup %2902 }
 0x989   :  { %v2905_v38 = vpop.eup %2904  ;;  %971 = vrot.lane.b32.xlu1 %v2903_v37, %s3158_s1 }
 0x98a   :  { %973 = vrot.lane.b32.xlu0 %v2905_v38, %s3158_s1  ;;  %v2907_v39 = vpop.eup %2906 }
 0x98b   :  { %v2909_v43 = vpop.eup %2908 }
 0x98c   :  { %v2911_v45 = vpop.eup %2910  ;;  %v953_v46 = vadd.f32 1.0, %v2909_v43 }
 0x98d   :  { %848 = vrot.lane.b32.xlu1 %v2907_v39, %s3158_s1  ;;  %v954_v49 = vadd.f32 1.0, %v2911_v45  ;;  %v2913_v50 = vpop.eup %2912 }
 0x98e   :  { %2914 = vrcp.f32 %v953_v46  ;;  %v842_v54 = vadd.f32 1.0, %v2913_v50 }
 0x98f   :  { %2916 = vrcp.f32 %v954_v49 }
 0x990   :  { %2918 = vrcp.f32 %v842_v54 }
 0x998   :  { %v2915_v55 = vpop.eup %2914 }
 0x999   :  { %v2917_v47 = vpop.eup %2916  ;;  %v967_v7 = vmul.f32 %v2915_v55, %v963_v52 }
 0x99a   :  { %v2919_v0 = vpop.eup %2918  ;;  %v968_v10 = vmul.f32 %v2917_v47, %v964_v5 }
 0x99b   :  { %v846_v14 = vmul.f32 %v2919_v0, %v3418_v4 }
 0x9fb   :  { %v972_v44 = vpop.permute.xlu1 %971 }
 0x9fc   :  { %v974_v58 = vpop.permute.xlu0 %973  ;;  %v977_v59 = vmul.f32 %v2915_v55, %v972_v44 }
 0x9fd   :  { %v978_v60 = vmul.f32 %v2917_v47, %v974_v58 }
 0x9fe   :  { %981 = vrot.lane.b32.xlu0 %v977_v59, %s3158_s1 }
 0x9ff   :  { %983 = vrot.lane.b32.xlu1 %v978_v60, %s3158_s1  ;;  %v849_v3 = vpop.permute.xlu1 %848 }
 0xa00   :  { %v851_v48 = vmul.f32 %v2919_v0, %v849_v3 }
 0xa02   :  { %853 = vrot.lane.b32.xlu0 %v851_v48, %s3158_s1 }
 0xa70   :  { %v982_v8 = vpop.permute.xlu0 %981 }
 0xa71   :  { %v3463_v11 = vadd.f32 %v982_v8, %v967_v7  ;;  %v984_v56 = vpop.permute.xlu1 %983 }
 0xa72   :  { %v3465_v12 = vadd.f32 %v984_v56, %v968_v10 }
 0xa73   :  { %2920 = vtanh.f32 %v3463_v11 }
 0xa74   :  { %2922 = vtanh.f32 %v3465_v12  ;;  %v854_v15 = vpop.permute.xlu0 %853 }
 0xa75   :  { %v3470_v18 = vadd.f32 %v854_v15, %v846_v14 }
 0xa77   :  { %2924 = vtanh.f32 %v3470_v18 }
 0xa7d   :  { %v2921_v62 = vpop.eup %2920 }
 0xa7e   :  { %v2923_v63 = vpop.eup %2922  ;;  %993 = vrot.lane.b32.xlu1 %v2921_v62, %s3158_s1 }
 0xa7f   :  { %995 = vrot.lane.b32.xlu0 %v2923_v63, %s3158_s1 }
 0xa81   :  { %v2925_v20 = vpop.eup %2924 }
 0xa82   :  { %859 = vrot.lane.b32.xlu1 %v2925_v20, %s3158_s1 }
 0xaf0   :  { %v994_v22 = vpop.permute.xlu1 %993 }
 0xaf1   :  { %v996_v23 = vpop.permute.xlu0 %995  ;;  %v999_v24 = vmul.f32 %v2915_v55, %v994_v22  ;;  %v1213_v22 = vrot.slane %v3463_v11, 7 }
 0xaf2   :  { %v1000_v26 = vmul.f32 %v2917_v47, %v996_v23  ;;  %v1214_v23 = vrot.slane %v3465_v12, 7 }
 0xaf3   :  { %v1113_v28 = vrot.slane %v999_v24, 3 }
 0xaf4   :  { %v1003_v4 = vrot.slane %v1000_v26, 7  ;;  %v860_v27 = vpop.permute.xlu1 %859  ;;  %v1114_v29 = vrot.slane %v1000_v26, 2 }
 0xaf5   :  { %v862_v30 = vmul.f32 %v2919_v0, %v860_v27 }
 0xaf6   :  { %v1005_v31 = vsel %vm1004_vm6, %v1003_v4, %v999_v24  ;;  %v1115_v35 = vsel %vm260_vm1, %v1114_v29, %v1113_v28 }
 0xaf7   :  { %1006 = vrot.lane.b32.xlu0 %v1005_v31, %s3159_s3  ;;  %v1010_v32 = vrot.slane %v862_v30, 5  ;;  %v2120_v33 = vrot.slane %v862_v30, 4 }
 0xaf9   :  { %1011 = vrot.lane.b32.xlu1 %v1010_v32, %s3160_s14  ;;  %v3484_v36 = vsel %vm2133_vm8, %v2132_v34, %v2120_v33 }
 0xafb   :  { %1116 = vrot.lane.b32.xlu0 %v1115_v35, %s3159_s3 }
 0xb69   :  { %v1007_v37 = vpop.permute.xlu0 %1006 }
 0xb6b   :  { %v1012_v38 = vpop.permute.xlu1 %1011 }
 0xb6c   :  { %v1014_v39 = vsel %vm129_vm2, %v1007_v37, %v1012_v38 }
 0xb6d   :  { %v1117_v40 = vpop.permute.xlu0 %1116  ;;  %v1016_v41 = vrot.slane %v1014_v39, 3 }
 0xb6e   :  { %2551 = vmatmul.mubr.msk.f32.vlgmr.msra.gmra.mrb[6].mxu1 %vm129_vm2, %v1117_v40 }
 0xb6f   :  { %2753 = vmatpush3.bf16.msra.mxu1 %v3307_v51  ;;  %2569 = vmatprep.mubr.msk.f32.mxu1 %vm3156_vm0, %v3157_v2 }
 0xb70   :  { %2540 = vmatmul.mubr.msk.f32.vlgmr.msra.gmra.mrb[8].mxu0 %vm272_vm3, %v1016_v41  ;;  %2754 = vmatprep.subr.bf16.mxu1 %v3155_v1 }
 0xb71   :  { %2765 = vmatpush3.bf16.msra.mxu0 %v3270_v9  ;;  %2580 = vmatprep.mubr.msk.f32.mxu0 %vm3156_vm0, %v3157_v2 }
 0xb72   :  { %2766 = vmatprep.subr.bf16.mxu0 %v3155_v1 }
 0xb73   :  { %2756 = vmatpush3.bf16.msra.mxu1 %v3310_v53 }
 0xb74   :  { %2757 = vmatprep.subr.bf16.mxu1 %v3155_v1 }
 0xb75   :  { %2768 = vmatpush3.bf16.msra.mxu0 %v3273_v13 }
 0xb76   :  { %2769 = vmatprep.subr.bf16.mxu0 %v3155_v1 }
 0xb77   :  { %2759 = vmatpush3.bf16.msra.mxu1 %v3315_v57 }
 0xb78   :  { %2760 = vmatprep.subr.bf16.mxu1 %v3155_v1 }
 0xb7b   :  { %2762 = vmatpush3.bf16.msra.mxu1 %v3320_v61 }
 0xb7c   :  { %2781 = vmatprep.subr.bf16.mxu1 %v3155_v1 }
 0xc41   :  { %v1186_v6 = vpop.f32.mrb[6].mxu1 }
 0xc42   :  { %v1191_v16 = vrot.slane %v1186_v6, 4  ;;  %v1192_v19 = vrot.slane %v1186_v6, 5  ;;  %v2552_v42 = vpop.f32.mrb[7].mxu1 }
 0xc43   :  { %v1085_v43 = vpop.f32.mrb[8].mxu0 }
 0xc44   :  { %v1195_v45 = vadd.f32 %v1191_v16, %v3293_v25  ;;  %v1196_v46 = vadd.f32 %v1192_v19, %v3291_v21  ;;  %v2541_v49 = vpop.f32.mrb[9].mxu0  ;;  %v1086_v50 = vadd.f32 %v3351_v17, %v1085_v43 }
 0xc46   :  { %2926 = vtanh.f32 %v1195_v45  ;;  %v2282_v47 = vmul.f32 -1.442695, %v1195_v45  ;;  %v2283_v58 = vmul.f32 -1.442695, %v1196_v46  ;;  %v2280_v59 = vmul.f32 -1.442695, %v1086_v50 }
 0xc47   :  { %2928 = vtanh.f32 %v1196_v46 }
 0xc48   :  { %2930 = vtanh.f32 %v1086_v50 }
 0xc49   :  { %2932 = vpow2.f32 %v2282_v47 }
 0xc4a   :  { %2934 = vpow2.f32 %v2283_v58 }
 0xc4b   :  { %2936 = vpow2.f32 %v2280_v59 }
 0xc50   :  { %v2927_v54 = vpop.eup %2926 }
 0xc51   :  { %v2929_v55 = vpop.eup %2928  ;;  %1221 = vrot.lane.b32.xlu1 %v2927_v54, %s3158_s1 }
 0xc52   :  { %1223 = vrot.lane.b32.xlu0 %v2929_v55, %s3158_s1  ;;  %v2931_v44 = vpop.eup %2930 }
 0xc53   :  { %v2933_v60 = vpop.eup %2932 }
 0xc54   :  { %v2935_v0 = vpop.eup %2934  ;;  %v1203_v3 = vadd.f32 1.0, %v2933_v60 }
 0xc55   :  { %1098 = vrot.lane.b32.xlu1 %v2931_v44, %s3158_s1  ;;  %v1204_v48 = vadd.f32 1.0, %v2935_v0  ;;  %v2937_v52 = vpop.eup %2936 }
 0xc56   :  { %2938 = vrcp.f32 %v1203_v3  ;;  %v1092_v5 = vadd.f32 1.0, %v2937_v52 }
 0xc57   :  { %2940 = vrcp.f32 %v1204_v48 }
 0xc58   :  { %2942 = vrcp.f32 %v1092_v5 }
 0xc60   :  { %v2939_v7 = vpop.eup %2938 }
 0xc61   :  { %v2941_v10 = vpop.eup %2940  ;;  %v1217_v24 = vmul.f32 %v2939_v7, %v1213_v22 }
 0xc62   :  { %v2943_v62 = vpop.eup %2942  ;;  %v1218_v26 = vmul.f32 %v2941_v10, %v1214_v23 }
 0xc63   :  { %v1096_v30 = vmul.f32 %v2943_v62, %v3470_v18 }
 0xcc3   :  { %v1222_v8 = vpop.permute.xlu1 %1221 }
 0xcc4   :  { %v1224_v56 = vpop.permute.xlu0 %1223  ;;  %v1227_v14 = vmul.f32 %v2939_v7, %v1222_v8 }
 0xcc5   :  { %v1228_v15 = vmul.f32 %v2941_v10, %v1224_v56 }
 0xcc6   :  { %1231 = vrot.lane.b32.xlu0 %v1227_v14, %s3158_s1 }
 0xcc7   :  { %1233 = vrot.lane.b32.xlu1 %v1228_v15, %s3158_s1  ;;  %v1099_v63 = vpop.permute.xlu1 %1098 }
 0xcc8   :  { %v1101_v20 = vmul.f32 %v2943_v62, %v1099_v63 }
 0xcca   :  { %1103 = vrot.lane.b32.xlu0 %v1101_v20, %s3158_s1 }
 0xd38   :  { %v1232_v4 = vpop.permute.xlu0 %1231 }
 0xd39   :  { %v1234_v27 = vpop.permute.xlu1 %1233  ;;  %v3517_v28 = vadd.f32 %v1232_v4, %v1217_v24 }
 0xd3a   :  { %v3519_v29 = vadd.f32 %v1234_v27, %v1218_v26 }
 0xd3b   :  { %2944 = vtanh.f32 %v3517_v28 }
 0xd3c   :  { %2946 = vtanh.f32 %v3519_v29  ;;  %v1104_v31 = vpop.permute.xlu0 %1103 }
 0xd3d   :  { %v3524_v32 = vadd.f32 %v1104_v31, %v1096_v30 }
 0xd3f   :  { %2948 = vtanh.f32 %v3524_v32 }
 0xd45   :  { %v2945_v11 = vpop.eup %2944 }
 0xd46   :  { %v2947_v12 = vpop.eup %2946  ;;  %1243 = vrot.lane.b32.xlu1 %v2945_v11, %s3158_s1 }
 0xd47   :  { %1245 = vrot.lane.b32.xlu0 %v2947_v12, %s3158_s1  ;;  %v1463_v12 = vrot.slane %v3517_v28, 7 }
 0xd49   :  { %v2949_v33 = vpop.eup %2948 }
 0xd4a   :  { %1109 = vrot.lane.b32.xlu1 %v2949_v33, %s3158_s1  ;;  %v1464_v33 = vrot.slane %v3519_v29, 7 }
 0xdb8   :  { %v1244_v34 = vpop.permute.xlu1 %1243 }
 0xdb9   :  { %v1246_v35 = vpop.permute.xlu0 %1245  ;;  %v1249_v38 = vmul.f32 %v2939_v7, %v1244_v34 }
 0xdba   :  { %v1250_v37 = vmul.f32 %v2941_v10, %v1246_v35 }
 0xdbb   :  { %v1363_v41 = vrot.slane %v1249_v38, 4 }
 0xdbc   :  { %v1253_v18 = vrot.slane %v1250_v37, 7  ;;  %v1110_v39 = vpop.permute.xlu1 %1109  ;;  %v1364_v40 = vrot.slane %v1250_v37, 3 }
 0xdbd   :  { %v1112_v6 = vmul.f32 %v2943_v62, %v1110_v39 }
 0xdbe   :  { %v1255_v16 = vsel %vm1254_vm9, %v1253_v18, %v1249_v38  ;;  %v1365_v43 = vsel %vm260_vm1, %v1364_v40, %v1363_v41 }
 0xdbf   :  { %1256 = vrot.lane.b32.xlu0 %v1255_v16, %s3159_s3  ;;  %v1260_v19 = vrot.slane %v1112_v6, 4  ;;  %v2122_v42 = vrot.slane %v1112_v6, 2 }
 0xdc1   :  { %1261 = vrot.lane.b32.xlu1 %v1260_v19, %s3160_s14  ;;  %v3535_v45 = vsel %vm2135_vm10, %v3484_v36, %v2122_v42 }
 0xdc3   :  { %1366 = vrot.lane.b32.xlu0 %v1365_v43, %s3159_s3 }
 0xe31   :  { %v1257_v46 = vpop.permute.xlu0 %1256 }
 0xe33   :  { %v1262_v49 = vpop.permute.xlu1 %1261 }
 0xe34   :  { %v1264_v50 = vsel %vm129_vm2, %v1257_v46, %v1262_v49 }
 0xe35   :  { %v1367_v54 = vpop.permute.xlu0 %1366  ;;  %v1266_v55 = vrot.slane %v1264_v50, 4 }
 0xe36   :  { %2581 = vmatmul.mubr.msk.f32.vlgmr.msra.gmra.mrb[10].mxu0 %vm129_vm2, %v1367_v54 }
 0xe37   :  { %2771 = vmatpush3.bf16.msra.mxu0 %v3307_v51  ;;  %2599 = vmatprep.mubr.msk.f32.mxu0 %vm3156_vm0, %v3157_v2 }
 0xe38   :  { %2570 = vmatmul.mubr.msk.f32.vlgmr.msra.gmra.mrb[8].mxu1 %vm272_vm3, %v1266_v55  ;;  %2772 = vmatprep.subr.bf16.mxu0 %v3155_v1 }
 0xe39   :  { %2783 = vmatpush3.bf16.msra.mxu1 %v3270_v9  ;;  %2610 = vmatprep.mubr.msk.f32.mxu1 %vm3156_vm0, %v3157_v2 }
 0xe3a   :  { %2784 = vmatprep.subr.bf16.mxu1 %v3155_v1 }
 0xe3b   :  { %2774 = vmatpush3.bf16.msra.mxu0 %v3310_v53 }
 0xe3c   :  { %2775 = vmatprep.subr.bf16.mxu0 %v3155_v1 }
 0xe3d   :  { %2786 = vmatpush3.bf16.msra.mxu1 %v3273_v13 }
 0xe3e   :  { %2787 = vmatprep.subr.bf16.mxu1 %v3155_v1 }
 0xe3f   :  { %2777 = vmatpush3.bf16.msra.mxu0 %v3315_v57 }
 0xe40   :  { %2778 = vmatprep.subr.bf16.mxu0 %v3155_v1 }
 0xe43   :  { %2780 = vmatpush3.bf16.msra.mxu0 %v3320_v61 }
 0xe44   :  { %2799 = vmatprep.subr.bf16.mxu0 %v3155_v1 }
 0xf09   :  { %v1436_v36 = vpop.f32.mrb[10].mxu0 }
 0xf0a   :  { %v1441_v44 = vrot.slane %v1436_v36, 3  ;;  %v1442_v47 = vrot.slane %v1436_v36, 4  ;;  %v2582_v58 = vpop.f32.mrb[11].mxu0 }
 0xf0b   :  { %v1335_v59 = vpop.f32.mrb[8].mxu1 }
 0xf0c   :  { %v1445_v60 = vadd.f32 %v1441_v44, %v3293_v25  ;;  %v1446_v0 = vadd.f32 %v1442_v47, %v3291_v21  ;;  %v2571_v3 = vpop.f32.mrb[9].mxu1  ;;  %v1336_v48 = vadd.f32 %v3351_v17, %v1335_v59 }
 0xf0e   :  { %2950 = vtanh.f32 %v1445_v60  ;;  %v2287_v8 = vmul.f32 -1.442695, %v1445_v60  ;;  %v2288_v10 = vmul.f32 -1.442695, %v1446_v0  ;;  %v2285_v56 = vmul.f32 -1.442695, %v1336_v48 }
 0xf0f   :  { %2952 = vtanh.f32 %v1446_v0 }
 0xf10   :  { %2954 = vtanh.f32 %v1336_v48 }
 0xf11   :  { %2956 = vpow2.f32 %v2287_v8 }
 0xf12   :  { %2958 = vpow2.f32 %v2288_v10 }
 0xf13   :  { %2960 = vpow2.f32 %v2285_v56 }
 0xf18   :  { %v2951_v52 = vpop.eup %2950 }
 0xf19   :  { %v2953_v5 = vpop.eup %2952  ;;  %1471 = vrot.lane.b32.xlu1 %v2951_v52, %s3158_s1 }
 0xf1a   :  { %1473 = vrot.lane.b32.xlu0 %v2953_v5, %s3158_s1  ;;  %v2955_v7 = vpop.eup %2954 }
 0xf1b   :  { %v2957_v14 = vpop.eup %2956 }
 0xf1c   :  { %v2959_v15 = vpop.eup %2958  ;;  %v1453_v62 = vadd.f32 1.0, %v2957_v14 }
 0xf1d   :  { %1348 = vrot.lane.b32.xlu1 %v2955_v7, %s3158_s1  ;;  %v1454_v17 = vadd.f32 1.0, %v2959_v15  ;;  %v2961_v63 = vpop.eup %2960 }
 0xf1e   :  { %2962 = vrcp.f32 %v1453_v62  ;;  %v1342_v20 = vadd.f32 1.0, %v2961_v63 }
 0xf1f   :  { %2964 = vrcp.f32 %v1454_v17 }
 0xf20   :  { %2966 = vrcp.f32 %v1342_v20 }
 0xf28   :  { %v2963_v22 = vpop.eup %2962 }
 0xf29   :  { %v2965_v24 = vpop.eup %2964  ;;  %v1467_v34 = vmul.f32 %v2963_v22, %v1463_v12 }
 0xf2a   :  { %v2967_v30 = vpop.eup %2966  ;;  %v1468_v37 = vmul.f32 %v2965_v24, %v1464_v33 }
 0xf2b   :  { %v1346_v40 = vmul.f32 %v2967_v30, %v3524_v32 }
 0xf8b   :  { %v1472_v23 = vpop.permute.xlu1 %1471 }
 0xf8c   :  { %v1474_v26 = vpop.permute.xlu0 %1473  ;;  %v1477_v4 = vmul.f32 %v2963_v22, %v1472_v23 }
 0xf8d   :  { %v1478_v27 = vmul.f32 %v2965_v24, %v1474_v26 }
 0xf8e   :  { %1481 = vrot.lane.b32.xlu0 %v1477_v4, %s3158_s1 }
 0xf8f   :  { %1483 = vrot.lane.b32.xlu1 %v1478_v27, %s3158_s1  ;;  %v1349_v31 = vpop.permute.xlu1 %1348 }
 0xf90   :  { %v1351_v11 = vmul.f32 %v2967_v30, %v1349_v31 }
 0xf92   :  { %1353 = vrot.lane.b32.xlu0 %v1351_v11, %s3158_s1 }
0x1000   :  { %v1482_v35 = vpop.permute.xlu0 %1481 }
0x1001   :  { %v3568_v38 = vadd.f32 %v1482_v35, %v1467_v34  ;;  %v1484_v18 = vpop.permute.xlu1 %1483 }
0x1002   :  { %v3570_v39 = vadd.f32 %v1484_v18, %v1468_v37 }
0x1003   :  { %2968 = vtanh.f32 %v3568_v38 }
0x1004   :  { %2970 = vtanh.f32 %v3570_v39  ;;  %v1354_v41 = vpop.permute.xlu0 %1353 }
0x1005   :  { %v3575_v6 = vadd.f32 %v1354_v41, %v1346_v40  ;;  %v1714_v41 = vrot.slane %v3570_v39, 7 }
0x1007   :  { %2972 = vtanh.f32 %v3575_v6 }
0x100d   :  { %v2969_v28 = vpop.eup %2968 }
0x100e   :  { %v2971_v29 = vpop.eup %2970  ;;  %1493 = vrot.lane.b32.xlu1 %v2969_v28, %s3158_s1 }
0x100f   :  { %1495 = vrot.lane.b32.xlu0 %v2971_v29, %s3158_s1 }
0x1011   :  { %v2973_v16 = vpop.eup %2972 }
0x1012   :  { %1359 = vrot.lane.b32.xlu1 %v2973_v16, %s3158_s1  ;;  %v1713_v16 = vrot.slane %v3568_v38, 7 }
0x1080   :  { %v1494_v19 = vpop.permute.xlu1 %1493 }
0x1081   :  { %v1496_v42 = vpop.permute.xlu0 %1495  ;;  %v1499_v43 = vmul.f32 %v2963_v22, %v1494_v19 }
0x1082   :  { %v1500_v46 = vmul.f32 %v2965_v24, %v1496_v42 }
0x1083   :  { %v1613_v50 = vrot.slane %v1499_v43, 5 }
0x1084   :  { %v1503_v32 = vrot.slane %v1500_v46, 7  ;;  %v1360_v49 = vpop.permute.xlu1 %1359  ;;  %v1614_v54 = vrot.slane %v1500_v46, 4 }
0x1085   :  { %v3581_v55 = vmul.f32 %v2967_v30, %v1360_v49 }
0x1086   :  { %v1505_v36 = vsel %vm1504_vm11, %v1503_v32, %v1499_v43  ;;  %v1615_v47 = vsel %vm260_vm1, %v1614_v54, %v1613_v50 }
0x1087   :  { %1506 = vrot.lane.b32.xlu0 %v1505_v36, %s3159_s3  ;;  %v1510_v44 = vrot.slane %v3581_v55, 3 }
0x1089   :  { %1511 = vrot.lane.b32.xlu1 %v1510_v44, %s3160_s14 }
0x108b   :  { %1616 = vrot.lane.b32.xlu0 %v1615_v47, %s3159_s3 }
0x10f9   :  { %v1507_v58 = vpop.permute.xlu0 %1506 }
0x10fb   :  { %v1512_v59 = vpop.permute.xlu1 %1511 }
0x10fc   :  { %v1514_v60 = vsel %vm129_vm2, %v1507_v58, %v1512_v59 }
0x10fd   :  { %v1617_v0 = vpop.permute.xlu0 %1616  ;;  %v1516_v3 = vrot.slane %v1514_v60, 5 }
0x10fe   :  { %2611 = vmatmul.mubr.msk.f32.vlgmr.msra.gmra.mrb[10].mxu1 %vm129_vm2, %v1617_v0 }
0x10ff   :  { %2789 = vmatpush3.bf16.msra.mxu1 %v3307_v51  ;;  %2629 = vmatprep.mubr.msk.f32.mxu1 %vm3156_vm0, %v3157_v2 }
0x1100   :  { %2600 = vmatmul.mubr.msk.f32.vlgmr.msra.gmra.mrb[12].mxu0 %vm272_vm3, %v1516_v3  ;;  %2790 = vmatprep.subr.bf16.mxu1 %v3155_v1 }
0x1101   :  { %2801 = vmatpush3.bf16.msra.mxu0 %v3270_v9  ;;  %2640 = vmatprep.mubr.msk.f32.mxu0 %vm3156_vm0, %v3157_v2 }
0x1102   :  { %2802 = vmatprep.subr.bf16.mxu0 %v3155_v1 }
0x1103   :  { %2792 = vmatpush3.bf16.msra.mxu1 %v3310_v53 }
0x1104   :  { %2793 = vmatprep.subr.bf16.mxu1 %v3155_v1 }
0x1105   :  { %2804 = vmatpush3.bf16.msra.mxu0 %v3273_v13  ;;  %v3611_v13 = vld [vmem:[%s3712_s5] ss:$0 sm:$0xff] }
0x1106   :  { %2805 = vmatprep.subr.bf16.mxu0 %v3155_v1 }
0x1107   :  { %2795 = vmatpush3.bf16.msra.mxu1 %v3315_v57 }
0x1108   :  { %2796 = vmatprep.subr.bf16.mxu1 %v3155_v1 }
0x110b   :  { %2798 = vmatpush3.bf16.msra.mxu1 %v3320_v61 }
0x11d1   :  { %v1686_v9 = vpop.f32.mrb[10].mxu1 }
0x11d2   :  { %v1691_v48 = vrot.slane %v1686_v9, 2  ;;  %v1692_v52 = vrot.slane %v1686_v9, 3  ;;  %v2612_v5 = vpop.f32.mrb[11].mxu1 }
0x11d3   :  { %v1585_v7 = vpop.f32.mrb[12].mxu0 }
0x11d4   :  { %v1696_v8 = vadd.f32 %v1692_v52, %v3291_v21  ;;  %v2601_v10 = vpop.f32.mrb[13].mxu0  ;;  %v1695_v56 = vadd.f32 %v1691_v48, %v3293_v25  ;;  %v1586_v14 = vadd.f32 %v3611_v13, %v1585_v7 }
0x11d6   :  { %2974 = vtanh.f32 %v1696_v8  ;;  %v2293_v63 = vmul.f32 -1.442695, %v1696_v8  ;;  %v2292_v20 = vmul.f32 -1.442695, %v1695_v56  ;;  %v2290_v22 = vmul.f32 -1.442695, %v1586_v14 }
0x11d7   :  { %2976 = vtanh.f32 %v1695_v56 }
0x11d8   :  { %2978 = vtanh.f32 %v1586_v14 }
0x11d9   :  { %2980 = vpow2.f32 %v2293_v63 }
0x11da   :  { %2982 = vpow2.f32 %v2292_v20 }
0x11db   :  { %2984 = vpow2.f32 %v2290_v22 }
0x11e0   :  { %v2975_v15 = vpop.eup %2974 }
0x11e1   :  { %1723 = vrot.lane.b32.xlu1 %v2975_v15, %s3158_s1  ;;  %v2977_v62 = vpop.eup %2976 }
0x11e2   :  { %v2979_v17 = vpop.eup %2978 }
0x11e3   :  { %1598 = vrot.lane.b32.xlu0 %v2979_v17, %s3158_s1  ;;  %v2981_v23 = vpop.eup %2980 }
0x11e4   :  { %v2983_v24 = vpop.eup %2982  ;;  %v1704_v26 = vadd.f32 1.0, %v2981_v23 }
0x11e5   :  { %1721 = vrot.lane.b32.xlu1 %v2977_v62, %s3158_s1  ;;  %v2985_v4 = vpop.eup %2984  ;;  %v1703_v27 = vadd.f32 1.0, %v2983_v24 }
0x11e6   :  { %2986 = vrcp.f32 %v1704_v26  ;;  %v1592_v30 = vadd.f32 1.0, %v2985_v4 }
0x11e7   :  { %2988 = vrcp.f32 %v1703_v27 }
0x11e8   :  { %2990 = vrcp.f32 %v1592_v30 }
0x11f0   :  { %v2987_v31 = vpop.eup %2986 }
0x11f1   :  { %v2989_v33 = vpop.eup %2988  ;;  %v1718_v28 = vmul.f32 %v2987_v31, %v1714_v41 }
0x11f2   :  { %v2991_v34 = vpop.eup %2990  ;;  %v1717_v43 = vmul.f32 %v2989_v33, %v1713_v16 }
0x11f3   :  { %v1596_v42 = vmul.f32 %v2991_v34, %v3575_v6 }
0x1253   :  { %v1724_v11 = vpop.permute.xlu1 %1723 }
0x1254   :  { %v1728_v12 = vmul.f32 %v2987_v31, %v1724_v11 }
0x1255   :  { %v1599_v35 = vpop.permute.xlu0 %1598 }
0x1256   :  { %1733 = vrot.lane.b32.xlu0 %v1728_v12, %s3158_s1  ;;  %v1601_v18 = vmul.f32 %v2991_v34, %v1599_v35 }
0x1257   :  { %v1722_v37 = vpop.permute.xlu1 %1721 }
0x1258   :  { %v1727_v40 = vmul.f32 %v2989_v33, %v1722_v37  ;;  %1603 = vrot.lane.b32.xlu1 %v1601_v18, %s3158_s1 }
0x125a   :  { %1731 = vrot.lane.b32.xlu0 %v1727_v40, %s3158_s1 }
0x12c8   :  { %v1734_v29 = vpop.permute.xlu0 %1733 }
0x12c9   :  { %v3622_v19 = vadd.f32 %v1734_v29, %v1718_v28 }
0x12ca   :  { %v1604_v46 = vpop.permute.xlu1 %1603 }
0x12cb   :  { %2992 = vtanh.f32 %v3622_v19  ;;  %v3626_v49 = vadd.f32 %v1604_v46, %v1596_v42  ;;  %v1964_v29 = vrot.slane %v3622_v19, 7 }
0x12cc   :  { %v1732_v32 = vpop.permute.xlu0 %1731 }
0x12cd   :  { %v3628_v50 = vadd.f32 %v1732_v32, %v1717_v43  ;;  %2994 = vtanh.f32 %v3626_v49 }
0x12cf   :  { %2996 = vtanh.f32 %v3628_v50  ;;  %v1963_v16 = vrot.slane %v3628_v50, 7 }
0x12d5   :  { %v2993_v39 = vpop.eup %2992 }
0x12d6   :  { %1745 = vrot.lane.b32.xlu1 %v2993_v39, %s3158_s1 }
0x12d7   :  { %v2995_v38 = vpop.eup %2994 }
0x12d8   :  { %1609 = vrot.lane.b32.xlu0 %v2995_v38, %s3158_s1 }
0x12d9   :  { %v2997_v54 = vpop.eup %2996 }
0x12da   :  { %1743 = vrot.lane.b32.xlu1 %v2997_v54, %s3158_s1 }
0x1348   :  { %v1746_v6 = vpop.permute.xlu1 %1745 }
0x1349   :  { %v1750_v36 = vmul.f32 %v2987_v31, %v1746_v6 }
0x134a   :  { %v1610_v44 = vpop.permute.xlu0 %1609 }
0x134b   :  { %v3635_v47 = vmul.f32 %v2991_v34, %v1610_v44  ;;  %v1753_v59 = vrot.slane %v1750_v36, 7  ;;  %v1864_v48 = vrot.slane %v1750_v36, 5 }
0x134c   :  { %v1744_v58 = vpop.permute.xlu1 %1743 }
0x134d   :  { %v1749_v60 = vmul.f32 %v2989_v33, %v1744_v58  ;;  %v1760_v0 = vrot.slane %v3635_v47, 2  ;;  %v2124_v19 = vrot.slane %v3635_v47, 6 }
0x134f   :  { %v1863_v3 = vrot.slane %v1749_v60, 6  ;;  %v1755_v9 = vsel %vm1754_vm12, %v1753_v59, %v1749_v60  ;;  %1761 = vrot.lane.b32.xlu1 %v1760_v0, %s3160_s14  ;;  %v2137_v60 = vsel %vm2131_vm7, %v3581_v55, %v2124_v19 }
0x1350   :  { %1756 = vrot.lane.b32.xlu0 %v1755_v9, %s3159_s3 }
0x1351   :  { %v1865_v52 = vsel %vm260_vm1, %v1864_v48, %v1863_v3 }
0x1354   :  { %1866 = vrot.lane.b32.xlu0 %v1865_v52, %s3159_s3 }
0x13c1   :  { %v1762_v5 = vpop.permute.xlu1 %1761 }
0x13c2   :  { %v1757_v7 = vpop.permute.xlu0 %1756 }
0x13c3   :  { %v1764_v8 = vsel %vm129_vm2, %v1757_v7, %v1762_v5 }
0x13c4   :  { %v1766_v10 = vrot.slane %v1764_v8, 6 }
0x13c6   :  { %v1867_v56 = vpop.permute.xlu0 %1866  ;;  %2630 = vmatmul.mubr.msk.f32.vlgmr.msra.gmra.mrb[12].mxu1 %vm272_vm3, %v1766_v10 }
0x13c7   :  { %2641 = vmatmul.mubr.msk.f32.vlgmr.msra.gmra.mrb[14].mxu0 %vm129_vm2, %v1867_v56 }
0x13c8   :  { %2807 = vmatpush3.bf16.msra.mxu0 %v3307_v51  ;;  %2659 = vmatprep.mubr.msk.f32.mxu0 %vm3156_vm0, %v3157_v2 }
0x13c9   :  { %2808 = vmatprep.subr.bf16.mxu0 %v3155_v1 }
0x13cc   :  { %2810 = vmatpush3.bf16.msra.mxu0 %v3310_v53 }
0x13cd   :  { %2811 = vmatprep.subr.bf16.mxu0 %v3155_v1 }
0x13d0   :  { %2813 = vmatpush3.bf16.msra.mxu0 %v3315_v57 }
0x13d1   :  { %2814 = vmatprep.subr.bf16.mxu0 %v3155_v1 }
0x13d4   :  { %2816 = vmatpush3.bf16.msra.mxu0 %v3320_v61 }
0x1499   :  { %v1835_v14 = vpop.f32.mrb[12].mxu1 }
0x149a   :  { %v1836_v15 = vadd.f32 %v3611_v13, %v1835_v14  ;;  %v2631_v62 = vpop.f32.mrb[13].mxu1  ;;  %v1936_v51 = vpop.f32.mrb[14].mxu0 }
0x149b   :  { %v1941_v17 = vrot.slane %v1936_v51, 1  ;;  %v1942_v63 = vrot.slane %v1936_v51, 2  ;;  %v2642_v2 = vpop.f32.mrb[15].mxu0 }
0x149c   :  { %2998 = vtanh.f32 %v1836_v15  ;;  %v2295_v22 = vmul.f32 -1.442695, %v1836_v15 }
0x149d   :  { %v1945_v20 = vadd.f32 %v1941_v17, %v3293_v25  ;;  %v1946_v53 = vadd.f32 %v1942_v63, %v3291_v21 }
0x149f   :  { %3000 = vtanh.f32 %v1945_v20  ;;  %v2297_v23 = vmul.f32 -1.442695, %v1945_v20  ;;  %v2298_v24 = vmul.f32 -1.442695, %v1946_v53 }
0x14a0   :  { %3002 = vtanh.f32 %v1946_v53 }
0x14a1   :  { %3004 = vpow2.f32 %v2295_v22 }
0x14a2   :  { %3006 = vpow2.f32 %v2297_v23 }
0x14a3   :  { %3008 = vpow2.f32 %v2298_v24 }
0x14a6   :  { %v2999_v57 = vpop.eup %2998 }
0x14a7   :  { %1848 = vrot.lane.b32.xlu1 %v2999_v57, %s3158_s1 }
0x14a9   :  { %v3001_v1 = vpop.eup %3000 }
0x14aa   :  { %v3003_v61 = vpop.eup %3002 }
0x14ab   :  { %1973 = vrot.lane.b32.xlu0 %v3003_v61, %s3158_s1  ;;  %1971 = vrot.lane.b32.xlu1 %v3001_v1, %s3158_s1  ;;  %v3005_v25 = vpop.eup %3004 }
0x14ac   :  { %v3007_v26 = vpop.eup %3006  ;;  %v1842_v21 = vadd.f32 1.0, %v3005_v25  ;;  %v2140_v25 = vld [vmem:[#allocation8] sm:$0xff] }
0x14ad   :  { %v3009_v4 = vpop.eup %3008  ;;  %v1953_v27 = vadd.f32 1.0, %v3007_v26  ;;  %v2141_v26 = vld [vmem:[#allocation8 + $0x8] sm:$0xff] }
0x14ae   :  { %3010 = vrcp.f32 %v1842_v21  ;;  %v1954_v30 = vadd.f32 1.0, %v3009_v4  ;;  %v2142_v21 = vld [vmem:[#allocation8 + $0x10] sm:$0xff]  ;;  %v2817_v4 = vpack.c.bf16 %v2141_v26, %v2140_v25 }
0x14af   :  { %3012 = vrcp.f32 %v1953_v27  ;;  %v2143_v27 = vld [vmem:[#allocation8 + $0x18] sm:$0xff] }
0x14b0   :  { %3014 = vrcp.f32 %v1954_v30  ;;  %v2821_v30 = vpack.c.bf16 %v2143_v27, %v2142_v21  ;;  %2818 = vmatprep.subr.bf16.mxu1 %v2817_v4 }
0x14b1   :  { %2820 = vmatpush3.bf16.msra.mxu1 %v2817_v4 }
0x14b2   :  { %2822 = vmatprep.subr.bf16.mxu1 %v2821_v30 }
0x14b5   :  { %2824 = vmatpush3.bf16.msra.mxu1 %v2821_v30 }
0x14b8   :  { %v3011_v31 = vpop.eup %3010 }
0x14b9   :  { %v3013_v33 = vpop.eup %3012  ;;  %v1846_v41 = vmul.f32 %v3011_v31, %v3626_v49 }
0x14ba   :  { %v3015_v34 = vpop.eup %3014  ;;  %v1967_v46 = vmul.f32 %v3013_v33, %v1963_v16 }
0x14bb   :  { %v1968_v43 = vmul.f32 %v3015_v34, %v1964_v29 }
0x1519   :  { %v1849_v11 = vpop.permute.xlu1 %1848 }
0x151a   :  { %v1851_v12 = vmul.f32 %v3011_v31, %v1849_v11 }
0x151c   :  { %1853 = vrot.lane.b32.xlu0 %v1851_v12, %s3158_s1 }
0x151d   :  { %v1974_v35 = vpop.permute.xlu0 %1973  ;;  %v1972_v37 = vpop.permute.xlu1 %1971 }
0x151e   :  { %v1978_v18 = vmul.f32 %v3015_v34, %v1974_v35  ;;  %v1977_v40 = vmul.f32 %v3013_v33, %v1972_v37  ;;  %v2301_v35 = vld [vmem:[%s3714_s7] ss:$0 sm:$0xff] }
0x1520   :  { %1983 = vrot.lane.b32.xlu1 %v1978_v18, %s3158_s1  ;;  %1981 = vrot.lane.b32.xlu0 %v1977_v40, %s3158_s1 }
0x158e   :  { %v1854_v28 = vpop.permute.xlu0 %1853 }
0x158f   :  { %v1856_v42 = vadd.f32 %v1854_v28, %v1846_v41 }
0x1591   :  { %3016 = vtanh.f32 %v1856_v42 }
0x1592   :  { %v1984_v32 = vpop.permute.xlu1 %1983  ;;  %v1982_v39 = vpop.permute.xlu0 %1981 }
0x1593   :  { %v1988_v38 = vadd.f32 %v1984_v32, %v1968_v43  ;;  %v1987_v54 = vadd.f32 %v1982_v39, %v1967_v46 }
0x1595   :  { %3018 = vtanh.f32 %v1988_v38 }
0x1596   :  { %3020 = vtanh.f32 %v1987_v54 }
0x159b   :  { %v3017_v6 = vpop.eup %3016 }
0x159c   :  { %1859 = vrot.lane.b32.xlu1 %v3017_v6, %s3158_s1 }
0x159f   :  { %v3019_v36 = vpop.eup %3018 }
0x15a0   :  { %v3021_v49 = vpop.eup %3020  ;;  %1995 = vrot.lane.b32.xlu0 %v3019_v36, %s3158_s1 }
0x15a1   :  { %1993 = vrot.lane.b32.xlu1 %v3021_v49, %s3158_s1 }
0x160e   :  { %v1860_v50 = vpop.permute.xlu1 %1859 }
0x160f   :  { %v1862_v44 = vmul.f32 %v3011_v31, %v1860_v50 }
0x1611   :  { %v2126_v58 = vrot.slane %v1862_v44, 4  ;;  %v2011_v5 = vrot.slane %v1862_v44, 1 }
0x1612   :  { %v1996_v59 = vpop.permute.xlu0 %1995 }
0x1613   :  { %v2000_v0 = vmul.f32 %v3015_v34, %v1996_v59  ;;  %v1994_v3 = vpop.permute.xlu1 %1993  ;;  %v2138_v9 = vsel %vm2133_vm8, %v2137_v60, %v2126_v58 }
0x1614   :  { %v1999_v48 = vmul.f32 %v3013_v33, %v1994_v3 }
0x1615   :  { %v2003_v52 = vrot.slane %v2000_v0, 7 }
0x1616   :  { %2004 = vrot.lane.b32.xlu0 %v1999_v48, %s3159_s3 }
0x1617   :  { %2006 = vrot.lane.b32.xlu1 %v2003_v52, %s3159_s3 }
0x161a   :  { %2012 = vrot.lane.b32.xlu0 %v2011_v5, %s3160_s14 }
0x1688   :  { %v2005_v47 = vpop.permute.xlu0 %2004 }
0x1689   :  { %v2007_v7 = vpop.permute.xlu1 %2006 }
0x168c   :  { %v2013_v8 = vpop.permute.xlu0 %2012 }
0x168d   :  { %v2015_v10 = vsel %vm129_vm2, %v2005_v47, %v2013_v8  ;;  %v2016_v55 = vsel %vm129_vm2, %v2007_v7, %v2013_v8 }
0x168e   :  { %v2020_v56 = vrot.slane %v2015_v10, 7  ;;  %v2021_v14 = vrot.slane %v2016_v55, 7 }
0x1690   :  { %v2022_v15 = vsel %vm2019_vm13, %v2020_v56, %v2021_v14 }
0x1691   :  { %2660 = vmatmul.mubr.msk.f32.vlgmr.msra.gmra.mrb[16].mxu0 %vm272_vm3, %v2022_v15 }
0x1764   :  { %v2091_v62 = vpop.f32.mrb[16].mxu0 }
0x1765   :  { %v2092_v51 = vadd.f32 %v3611_v13, %v2091_v62  ;;  %v2661_v17 = vpop.f32.mrb[17].mxu0 }
0x1767   :  { %3022 = vtanh.f32 %v2092_v51  ;;  %v2300_v2 = vmul.f32 -1.442695, %v2092_v51 }
0x1769   :  { %3024 = vpow2.f32 %v2300_v2 }
0x1771   :  { %v3023_v63 = vpop.eup %3022 }
0x1772   :  { %2104 = vrot.lane.b32.xlu1 %v3023_v63, %s3158_s1 }
0x1773   :  { %v3025_v20 = vpop.eup %3024 }
0x1774   :  { %v2098_v53 = vadd.f32 1.0, %v3025_v20 }
0x1776   :  { %3026 = vrcp.f32 %v2098_v53 }
0x1780   :  { %v3027_v57 = vpop.eup %3026 }
0x1781   :  { %v2102_v22 = vmul.f32 %v3027_v57, %v1856_v42 }
0x17e4   :  { %v2105_v1 = vpop.permute.xlu1 %2104 }
0x17e5   :  { %v2107_v61 = vmul.f32 %v3027_v57, %v2105_v1 }
0x17e7   :  { %2109 = vrot.lane.b32.xlu0 %v2107_v61, %s3158_s1 }
0x17eb   :  { %2153 = vrot.lane.b32.xlu0 %v3535_v45, %s3159_s3 }
0x1859   :  { %v2110_v13 = vpop.permute.xlu0 %2109 }
0x185a   :  { %v2112_v23 = vadd.f32 %v2110_v13, %v2102_v22 }
0x185c   :  { %3028 = vtanh.f32 %v2112_v23 }
0x185d   :  { %v2154_v24 = vpop.permute.xlu0 %2153 }
0x185e   :  { %2670 = vmatprep.mubr.msk.f32.mxu1 %vm129_vm2, %v2154_v24 }
0x1866   :  { %v3029_v31 = vpop.eup %3028 }
0x1867   :  { %2115 = vrot.lane.b32.xlu1 %v3029_v31, %s3158_s1 }
0x18d9   :  { %v2116_v45 = vpop.permute.xlu1 %2115 }
0x18da   :  { %v2118_v11 = vmul.f32 %v3027_v57, %v2116_v45 }
0x18dc   :  { %v2129_v12 = vrot.slane %v2118_v11, 2 }
0x18de   :  { %v2139_v33 = vsel %vm2135_vm10, %v2138_v9, %v2129_v12 }
0x18df   :  { %2155 = vrot.lane.b32.xlu1 %v2139_v33, %s3159_s3 }
0x1951   :  { %v2156_v34 = vpop.permute.xlu1 %2155 }
0x1952   :  { %2671 = vmatmul.mubr.msk.f32.vlgmr.msra.gmra.mrb[14].mxu1 %vm129_vm2, %v2156_v34 }
0x1a25   :  { %v2672_v37 = vpop.f32.mrb[14].mxu1 }
0x1a26   :  { %v2233_v18 = vadd.f32 %v2672_v37, %v2301_v35  ;;  %v2227_v40 = vpop.f32.mrb[15].mxu1 }
0x1a27   :  { %v2228_v41 = vadd.f32 %v2301_v35, %v2227_v40 }
0x1a28   :  { %v2237_v28 = vmax.f32 %v2233_v18, 0.0 }
0x1a29   :  { %v2236_v29 = vmax.f32 %v2228_v41, 0.0 }
0x1a2a   :  { %2239 = vst [vmem:[#allocation10 + $0x8] sm:$0xff] %v2237_v28 }
0x1a2b   :  { %2238 = vst [vmem:[#allocation10] sm:$0xff] %v2236_v29 }
0x1a2c   :  { %3130 = shalt.err (!%p3127_p8)
}
0x1a2d   :  { %s3131_s24 = scalar_lea.hbm %s3715_s8, 256 }
0x1a2e   :  { %p3132_p9 = scmp.ne.s32.totalorder %s3715_s8, %s3131_s24  ;;  %p3135_p10 = scmp.lt.u32.totalorder %s3131_s24, %s3715_s8 }
0x1a30   :  { %p3137_p11 = pnand %p3135_p10, %p3132_p9 }
0x1a32   :  { %3140 = shalt.err (!%p3137_p11)
}
0x1a33   :  { %2251 = dma.vmem_to_hbm [thread:$0]  %s2246_s20, 256, %s3715_s8, [#allocation4], %s3150_s15, %s3150_s15, %s3151_s16  }
0x1a34   :  { %3147 = dma.done.wait [#allocation4], 256  }
0x1a35   :  { %3148 = vsyncadd [#allocation4], 4294967040 }
0x1a36   :  { %2255 = vsyncpa [#allocation3], 1 }
0x1a37   :  { %2256 = vsyncpa [#allocation6], 1 }
0x1a38   :  { %2257 = vsyncpa [#allocation9], 1 }
0x1a39   :  { %2258 = vsyncpa [#allocation4], 1 }

</bundles_post_ra>
